<compile_context>
chip_gen: v7x
topology: tpu7x:2x2x1
jax: 0.10.0
libtpu: 0.0.40
codegen_flags: <defaults>
</compile_context>

<pallas_src>
import functools

import jax
import jax.numpy as jnp
import numpy as np
from jax.experimental import pallas as pl
from jax.experimental.pallas import tpu as pltpu

NEG_INF = -1e9
LN_EPS = 1e-5          # torch.nn.LayerNorm default eps
LEAKY_SLOPE = 0.2      # DGL GATConv default negative_slope


# ----------------------------------------------------------------------------
# In-kernel helpers
# ----------------------------------------------------------------------------
def _layernorm(x, gamma, beta):
    mu = jnp.mean(x, axis=-1, keepdims=True)
    var = jnp.mean((x - mu) ** 2, axis=-1, keepdims=True)
    return (x - mu) * jax.lax.rsqrt(var + LN_EPS) * gamma + beta


# ----------------------------------------------------------------------------
# Fully fused GraphTransformer forward kernel (all layers + out projection)
# ----------------------------------------------------------------------------
def gt_forward_kernel(num_layers, num_heads,
                      h_ref, adj_ref, wc_ref, are_ref, ale_ref, bg_ref,
                      gamma_ref, beta_ref, w1_ref, b1_ref, w2_ref, b2_ref,
                      wout_ref, bout_ref, out_ref, hgat_sc):
    h = h_ref[...]                                    # (N, D)
    adj = adj_ref[...]                                # (N, N)
    # Additive attention mask, computed ONCE for every layer / head.
    bias = jnp.where(adj > 0, 0.0, NEG_INF)           # (N, N)

    D = h.shape[1]
    Dh = D // num_heads

    for l in range(num_layers):                       # static unroll (L small)
        gamma = gamma_ref[l]                          # (1, D)
        beta = beta_ref[l]                            # (1, D)

        # ---- MultiHeadGATLayer: all heads in single lane-dense matmuls ----
        z = jnp.dot(h, wc_ref[l], preferred_element_type=jnp.float32)      # (N, H*Dh)
        # destination / source scores for ALL heads (a_r, a_l folded into W host-side)
        er = jnp.dot(h, are_ref[l], preferred_element_type=jnp.float32)    # (N, H)
        el = jnp.dot(h, ale_ref[l], preferred_element_type=jnp.float32)    # (N, H)
        el_t = jnp.transpose(el)                      # (H, N): one small XLU transpose / layer

        for hh in range(num_heads):
            # e[i, j] = er_h[i] + el_h[j]
            e = er[:, hh:hh + 1] + el_t[hh:hh + 1, :]                       # (N, N)
            e = jnp.where(e > 0, e, LEAKY_SLOPE * e) + bias                 # LeakyReLU + mask bias
            e = e - jnp.max(e, axis=-1, keepdims=True)                      # stable softmax
            p = jnp.exp(e)                            # masked entries underflow to exactly 0
            # exact reciprocal keeps the 1e-3 validation tight; use approx=True in production
            alpha = p * pl.reciprocal(jnp.sum(p, axis=-1, keepdims=True), approx=False)
            # write the head's slice straight into the contiguous output slab (no concat)
            hgat_sc[:, hh * Dh:(hh + 1) * Dh] = jnp.dot(
                alpha, z[:, hh * Dh:(hh + 1) * Dh],
                preferred_element_type=jnp.float32)

        h_gat = hgat_sc[...] + bg_ref[l]              # (N, D), per-head GATConv bias

        # ---- residual + LayerNorm (dropout is identity in eval mode) ----
        x = _layernorm(h_gat + h, gamma, beta)

        # TODO(synk): reference GraphTransformerLayer.forward calls self.feed_forward
        # which is never defined in __init__; implemented here as Linear -> ReLU -> Linear.
        y = jnp.dot(x, w1_ref[l], preferred_element_type=jnp.float32) + b1_ref[l]
        y = jnp.maximum(y, 0.0)
        y = jnp.dot(y, w2_ref[l], preferred_element_type=jnp.float32) + b2_ref[l]

        # ---- second residual + (same) LayerNorm ----
        h = _layernorm(x + y, gamma, beta)

    # ---- final out_projection (nn.Linear) fused into the same kernel ----
    out_ref[...] = (jnp.dot(h, wout_ref[...], preferred_element_type=jnp.float32)
                    + bout_ref[...])


def graph_transformer_forward(adj, h, layer_params, out_proj):
    """Fold per-head params, stack per-layer params, and run ONE pallas_call."""
    num_layers = len(layer_params)
    num_heads = layer_params[0]["W"].shape[0]
    N, D = h.shape

    wc, are, ale, bg, gm, bt, w1, b1, w2, b2 = ([] for _ in range(10))
    for p in layer_params:
        W = p["W"]                                     # (H, D_in, Dh)
        Hn, Din, Dh = W.shape
        # heads stacked along columns -> one matmul gives the concat output directly
        wc.append(jnp.transpose(W, (1, 0, 2)).reshape(Din, Hn * Dh))
        # er_h = (h @ W_h) @ a_r_h  ==  h @ (W_h @ a_r_h)   (fold host-side)
        are.append(jnp.einsum("hdk,hko->dh", W, p["a_r"]))      # (D_in, H)
        # el_h = (h @ W_h) @ a_l_h^T ==  h @ (W_h @ a_l_h^T)
        ale.append(jnp.einsum("hdk,hok->dh", W, p["a_l"]))      # (D_in, H)
        bg.append(p["b_gat"][:, 0, :].reshape(1, Hn * Dh))      # concat of per-head biases
        gm.append(p["gamma"]); bt.append(p["beta"])
        w1.append(p["w1"]); b1.append(p["b1"])
        w2.append(p["w2"]); b2.append(p["b2"])

    stacked = tuple(jnp.stack(x) for x in (wc, are, ale, bg, gm, bt, w1, b1, w2, b2))
    w_out, b_out = out_proj
    args = (h, adj) + stacked + (w_out, b_out)

    kernel = functools.partial(gt_forward_kernel, num_layers, num_heads)
    return pl.pallas_call(
        kernel,
        out_shape=jax.ShapeDtypeStruct((N, w_out.shape[1]), jnp.float32),
        in_specs=[pl.BlockSpec(memory_space=pltpu.MemorySpace.VMEM)] * len(args),
        out_specs=pl.BlockSpec(memory_space=pltpu.MemorySpace.VMEM),
        scratch_shapes=[pltpu.VMEM((N, D), jnp.float32)],
    )(*args)


# ----------------------------------------------------------------------------
# Pure-JAX reference (same math, no Pallas) for validation
# ----------------------------------------------------------------------------
def _layernorm_ref(x, gamma, beta):
    mu = jnp.mean(x, axis=-1, keepdims=True)
    var = jnp.mean((x - mu) ** 2, axis=-1, keepdims=True)
    return (x - mu) * jax.lax.rsqrt(var + LN_EPS) * gamma + beta


def gt_layer_ref(h, adj, p):
    num_heads = p["W"].shape[0]
    outs = []
    for hh in range(num_heads):
        z = h @ p["W"][hh]
        er = z @ p["a_r"][hh]                  # (N, 1)
        el_row = p["a_l"][hh] @ z.T            # (1, N)
        e = er + el_row
        e = jnp.where(e > 0, e, LEAKY_SLOPE * e)
        e = jnp.where(adj > 0, e, NEG_INF)
        e = e - jnp.max(e, axis=-1, keepdims=True)
        pm = jnp.where(adj > 0, jnp.exp(e), 0.0)
        alpha = pm / jnp.sum(pm, axis=-1, keepdims=True)
        outs.append(alpha @ z + p["b_gat"][hh])
    h_gat = jnp.concatenate(outs, axis=-1)
    x = _layernorm_ref(h_gat + h, p["gamma"], p["beta"])
    y = jnp.maximum(x @ p["w1"] + p["b1"], 0.0)
    y = y @ p["w2"] + p["b2"]
    return _layernorm_ref(x + y, p["gamma"], p["beta"])


def graph_transformer_ref(adj, h, layer_params, out_proj):
    for p in layer_params:
        h = gt_layer_ref(h, adj, p)
    w_out, b_out = out_proj
    return h @ w_out + b_out


# ----------------------------------------------------------------------------
# Deterministic parameter init (synthetic; shapes follow the PyTorch __init__)
# ----------------------------------------------------------------------------
def init_params(key, in_dim, hidden_dim, out_dim, num_heads, num_layers):
    head_dim = hidden_dim // num_heads
    dff = 2 * hidden_dim
    layers = []
    for i in range(num_layers):
        d_in = in_dim if i == 0 else hidden_dim
        key, *ks = jax.random.split(key, 9)
        layers.append(dict(
            W=jax.random.normal(ks[0], (num_heads, d_in, head_dim), jnp.float32)
              / np.sqrt(d_in),
            a_l=jax.random.normal(ks[1], (num_heads, 1, head_dim), jnp.float32) * 0.1,
            a_r=jax.random.normal(ks[2], (num_heads, head_dim, 1), jnp.float32) * 0.1,
            b_gat=jax.random.normal(ks[3], (num_heads, 1, head_dim), jnp.float32) * 0.01,
            gamma=jnp.ones((1, hidden_dim), jnp.float32),
            beta=jnp.zeros((1, hidden_dim), jnp.float32),
            w1=jax.random.normal(ks[4], (hidden_dim, dff), jnp.float32)
               / np.sqrt(hidden_dim),
            b1=jax.random.normal(ks[5], (1, dff), jnp.float32) * 0.01,
            w2=jax.random.normal(ks[6], (dff, hidden_dim), jnp.float32) / np.sqrt(dff),
            b2=jax.random.normal(ks[7], (1, hidden_dim), jnp.float32) * 0.01,
        ))
    key, k1, k2 = jax.random.split(key, 3)
    w_out = jax.random.normal(k1, (hidden_dim, out_dim), jnp.float32) / np.sqrt(hidden_dim)
    b_out = jax.random.normal(k2, (1, out_dim), jnp.float32) * 0.01
    return layers, (w_out, b_out)


# ----------------------------------------------------------------------------
# Main
# ----------------------------------------------------------------------------
if __name__ == "__main__":
    N = 16            # number of graph nodes
    IN_DIM = 32       # must equal hidden_dim (the residual `h + h_in` requires it)
    HIDDEN_DIM = 32
    OUT_DIM = 8
    NUM_HEADS = 4
    NUM_LAYERS = 2

    key = jax.random.PRNGKey(0)
    key, kh = jax.random.split(key)
    h = jax.random.normal(kh, (N, IN_DIM), jnp.float32)

    # Deterministic ring graph with self-loops: edges (j -> i) for j in
    # {i-1, i, i+1} (mod N).  adj[i, j] = 1.0 iff edge j -> i exists.
    adj_np = np.zeros((N, N), np.float32)
    for i in range(N):
        adj_np[i, i] = 1.0
        adj_np[i, (i - 1) % N] = 1.0
        adj_np[i, (i + 1) % N] = 1.0
    adj = jnp.asarray(adj_np)

    layer_params, out_proj = init_params(key, IN_DIM, HIDDEN_DIM, OUT_DIM,
                                         NUM_HEADS, NUM_LAYERS)

    out = graph_transformer_forward(adj, h, layer_params, out_proj)
    out = jax.block_until_ready(out)

    ref = graph_transformer_ref(adj, h, layer_params, out_proj)
    ref = jax.block_until_ready(ref)

    np.testing.assert_allclose(np.asarray(out), np.asarray(ref),
                               rtol=1e-3, atol=1e-3)
    assert out.shape == (N, OUT_DIM)
    print("KERNEL_OK")
</pallas_src>

<mosaic_0001>
module attributes {stable_mosaic.version = 11 : i64} {
  func.func @gt_forward_kernel(%arg0: memref<16x32xf32, #tpu.memory_space<vmem>>, %arg1: memref<16x16xf32, #tpu.memory_space<vmem>>, %arg2: memref<2x32x32xf32, #tpu.memory_space<vmem>>, %arg3: memref<2x32x4xf32, #tpu.memory_space<vmem>>, %arg4: memref<2x32x4xf32, #tpu.memory_space<vmem>>, %arg5: memref<2x1x32xf32, #tpu.memory_space<vmem>>, %arg6: memref<2x1x32xf32, #tpu.memory_space<vmem>>, %arg7: memref<2x1x32xf32, #tpu.memory_space<vmem>>, %arg8: memref<2x32x64xf32, #tpu.memory_space<vmem>>, %arg9: memref<2x1x64xf32, #tpu.memory_space<vmem>>, %arg10: memref<2x64x32xf32, #tpu.memory_space<vmem>>, %arg11: memref<2x1x32xf32, #tpu.memory_space<vmem>>, %arg12: memref<32x8xf32, #tpu.memory_space<vmem>>, %arg13: memref<1x8xf32, #tpu.memory_space<vmem>>, %arg14: memref<16x8xf32, #tpu.memory_space<vmem>>, %arg15: memref<16x32xf32, #tpu.memory_space<vmem>>) attributes {dimension_semantics = [], scalar_prefetch = 0 : i64, scratch_operands = 1 : i64, tpu.core_type = #tpu.core_type<tc>} {
    %c0 = arith.constant 0 : index
    %c0_0 = arith.constant 0 : index
    %0 = vector.load %arg0[%c0, %c0_0] : memref<16x32xf32, #tpu.memory_space<vmem>>, vector<16x32xf32>
    %c0_1 = arith.constant 0 : index
    %c0_2 = arith.constant 0 : index
    %1 = vector.load %arg1[%c0_1, %c0_2] : memref<16x16xf32, #tpu.memory_space<vmem>>, vector<16x16xf32>
    %cst = arith.constant 0.000000e+00 : f32
    %2 = vector.broadcast %cst : f32 to vector<16x16xf32>
    %3 = arith.cmpf ogt, %1, %2 : vector<16x16xf32>
    %cst_3 = arith.constant 0.000000e+00 : f32
    %cst_4 = arith.constant -1.000000e+09 : f32
    %4 = vector.broadcast %cst_3 : f32 to vector<16x16xf32>
    %5 = vector.broadcast %cst_4 : f32 to vector<16x16xf32>
    %6 = arith.select %3, %4, %5 : vector<16x16xi1>, vector<16x16xf32>
    %c0_5 = arith.constant 0 : index
    %c0_6 = arith.constant 0 : index
    %c0_7 = arith.constant 0 : index
    %7 = vector.load %arg6[%c0_5, %c0_6, %c0_7] : memref<2x1x32xf32, #tpu.memory_space<vmem>>, vector<1x1x32xf32>
    %8 = vector.shape_cast %7 : vector<1x1x32xf32> to vector<1x32xf32>
    %c0_8 = arith.constant 0 : index
    %c0_9 = arith.constant 0 : index
    %c0_10 = arith.constant 0 : index
    %9 = vector.load %arg7[%c0_8, %c0_9, %c0_10] : memref<2x1x32xf32, #tpu.memory_space<vmem>>, vector<1x1x32xf32>
    %10 = vector.shape_cast %9 : vector<1x1x32xf32> to vector<1x32xf32>
    %c0_11 = arith.constant 0 : index
    %c0_12 = arith.constant 0 : index
    %c0_13 = arith.constant 0 : index
    %11 = vector.load %arg2[%c0_11, %c0_12, %c0_13] : memref<2x32x32xf32, #tpu.memory_space<vmem>>, vector<1x32x32xf32>
    %12 = vector.shape_cast %11 : vector<1x32x32xf32> to vector<32x32xf32>
    %cst_14 = arith.constant dense<0.000000e+00> : vector<16x32xf32>
    %13 = tpu.matmul %0, %12, %cst_14 {dimension_numbers = #tpu.dot_dimension_numbers<[1], [0], [0], [1], [0, 0, 1, 1], [], []>} : vector<16x32xf32>, vector<32x32xf32>, vector<16x32xf32> -> vector<16x32xf32>
    %c0_15 = arith.constant 0 : index
    %c0_16 = arith.constant 0 : index
    %c0_17 = arith.constant 0 : index
    %14 = vector.load %arg3[%c0_15, %c0_16, %c0_17] : memref<2x32x4xf32, #tpu.memory_space<vmem>>, vector<1x32x4xf32>
    %15 = vector.shape_cast %14 : vector<1x32x4xf32> to vector<32x4xf32>
    %cst_18 = arith.constant dense<0.000000e+00> : vector<16x4xf32>
    %16 = tpu.matmul %0, %15, %cst_18 {dimension_numbers = #tpu.dot_dimension_numbers<[1], [0], [0], [1], [0, 0, 1, 1], [], []>} : vector<16x32xf32>, vector<32x4xf32>, vector<16x4xf32> -> vector<16x4xf32>
    %c0_19 = arith.constant 0 : index
    %c0_20 = arith.constant 0 : index
    %c0_21 = arith.constant 0 : index
    %17 = vector.load %arg4[%c0_19, %c0_20, %c0_21] : memref<2x32x4xf32, #tpu.memory_space<vmem>>, vector<1x32x4xf32>
    %18 = vector.shape_cast %17 : vector<1x32x4xf32> to vector<32x4xf32>
    %cst_22 = arith.constant dense<0.000000e+00> : vector<16x4xf32>
    %19 = tpu.matmul %0, %18, %cst_22 {dimension_numbers = #tpu.dot_dimension_numbers<[1], [0], [0], [1], [0, 0, 1, 1], [], []>} : vector<16x32xf32>, vector<32x4xf32>, vector<16x4xf32> -> vector<16x4xf32>
    %20 = tpu.transpose %19, [1, 0] : vector<16x4xf32> -> vector<4x16xf32>
    %21 = vector.extract_strided_slice %16 {offsets = [0, 0], sizes = [16, 1], strides = [1, 1]} : vector<16x4xf32> to vector<16x1xf32>
    %22 = vector.extract_strided_slice %20 {offsets = [0, 0], sizes = [1, 16], strides = [1, 1]} : vector<4x16xf32> to vector<1x16xf32>
    %23 = vector.broadcast %21 : vector<16x1xf32> to vector<16x16xf32>
    %24 = vector.broadcast %22 : vector<1x16xf32> to vector<16x16xf32>
    %25 = arith.addf %23, %24 : vector<16x16xf32>
    %cst_23 = arith.constant 0.000000e+00 : f32
    %26 = vector.broadcast %cst_23 : f32 to vector<16x16xf32>
    %27 = arith.cmpf ogt, %25, %26 : vector<16x16xf32>
    %cst_24 = arith.constant 2.000000e-01 : f32
    %28 = vector.broadcast %cst_24 : f32 to vector<16x16xf32>
    %29 = arith.mulf %28, %25 : vector<16x16xf32>
    %30 = arith.select %27, %25, %29 : vector<16x16xi1>, vector<16x16xf32>
    %31 = arith.addf %30, %6 : vector<16x16xf32>
    %cst_25 = arith.constant dense<0xFF800000> : vector<16xf32>
    %32 = vector.multi_reduction <maximumf>, %31, %cst_25 [1] : vector<16x16xf32> to vector<16xf32>
    %33 = vector.shape_cast %32 : vector<16xf32> to vector<16x1xf32>
    %34 = vector.broadcast %33 : vector<16x1xf32> to vector<16x16xf32>
    %35 = arith.subf %31, %34 : vector<16x16xf32>
    %36 = math.exp %35 : vector<16x16xf32>
    %cst_26 = arith.constant dense<0.000000e+00> : vector<16xf32>
    %37 = vector.multi_reduction <add>, %36, %cst_26 [1] : vector<16x16xf32> to vector<16xf32>
    %38 = vector.shape_cast %37 : vector<16xf32> to vector<16x1xf32>
    %39 = tpu.reciprocal %38 : vector<16x1xf32> -> vector<16x1xf32>
    %40 = vector.broadcast %39 : vector<16x1xf32> to vector<16x16xf32>
    %41 = arith.mulf %36, %40 : vector<16x16xf32>
    %42 = vector.extract_strided_slice %13 {offsets = [0, 0], sizes = [16, 8], strides = [1, 1]} : vector<16x32xf32> to vector<16x8xf32>
    %cst_27 = arith.constant dense<0.000000e+00> : vector<16x8xf32>
    %43 = tpu.matmul %41, %42, %cst_27 {dimension_numbers = #tpu.dot_dimension_numbers<[1], [0], [0], [1], [0, 0, 1, 1], [], []>} : vector<16x16xf32>, vector<16x8xf32>, vector<16x8xf32> -> vector<16x8xf32>
    %c0_28 = arith.constant 0 : index
    %c0_29 = arith.constant 0 : index
    %44 = vector.load %arg15[%c0_28, %c0_29] : memref<16x32xf32, #tpu.memory_space<vmem>>, vector<16x8xf32>
    tpu.vector_store %arg15[%c0_28, %c0_29], %43 {strides = array<i32>} : memref<16x32xf32, #tpu.memory_space<vmem>>, vector<16x8xf32>,
    %45 = vector.extract_strided_slice %16 {offsets = [0, 1], sizes = [16, 1], strides = [1, 1]} : vector<16x4xf32> to vector<16x1xf32>
    %46 = vector.extract_strided_slice %20 {offsets = [1, 0], sizes = [1, 16], strides = [1, 1]} : vector<4x16xf32> to vector<1x16xf32>
    %47 = vector.broadcast %45 : vector<16x1xf32> to vector<16x16xf32>
    %48 = vector.broadcast %46 : vector<1x16xf32> to vector<16x16xf32>
    %49 = arith.addf %47, %48 : vector<16x16xf32>
    %cst_30 = arith.constant 0.000000e+00 : f32
    %50 = vector.broadcast %cst_30 : f32 to vector<16x16xf32>
    %51 = arith.cmpf ogt, %49, %50 : vector<16x16xf32>
    %cst_31 = arith.constant 2.000000e-01 : f32
    %52 = vector.broadcast %cst_31 : f32 to vector<16x16xf32>
    %53 = arith.mulf %52, %49 : vector<16x16xf32>
    %54 = arith.select %51, %49, %53 : vector<16x16xi1>, vector<16x16xf32>
    %55 = arith.addf %54, %6 : vector<16x16xf32>
    %cst_32 = arith.constant dense<0xFF800000> : vector<16xf32>
    %56 = vector.multi_reduction <maximumf>, %55, %cst_32 [1] : vector<16x16xf32> to vector<16xf32>
    %57 = vector.shape_cast %56 : vector<16xf32> to vector<16x1xf32>
    %58 = vector.broadcast %57 : vector<16x1xf32> to vector<16x16xf32>
    %59 = arith.subf %55, %58 : vector<16x16xf32>
    %60 = math.exp %59 : vector<16x16xf32>
    %cst_33 = arith.constant dense<0.000000e+00> : vector<16xf32>
    %61 = vector.multi_reduction <add>, %60, %cst_33 [1] : vector<16x16xf32> to vector<16xf32>
    %62 = vector.shape_cast %61 : vector<16xf32> to vector<16x1xf32>
    %63 = tpu.reciprocal %62 : vector<16x1xf32> -> vector<16x1xf32>
    %64 = vector.broadcast %63 : vector<16x1xf32> to vector<16x16xf32>
    %65 = arith.mulf %60, %64 : vector<16x16xf32>
    %66 = vector.extract_strided_slice %13 {offsets = [0, 8], sizes = [16, 8], strides = [1, 1]} : vector<16x32xf32> to vector<16x8xf32>
    %cst_34 = arith.constant dense<0.000000e+00> : vector<16x8xf32>
    %67 = tpu.matmul %65, %66, %cst_34 {dimension_numbers = #tpu.dot_dimension_numbers<[1], [0], [0], [1], [0, 0, 1, 1], [], []>} : vector<16x16xf32>, vector<16x8xf32>, vector<16x8xf32> -> vector<16x8xf32>
    %c0_35 = arith.constant 0 : index
    %c8 = arith.constant 8 : index
    %68 = vector.load %arg15[%c0_35, %c8] : memref<16x32xf32, #tpu.memory_space<vmem>>, vector<16x8xf32>
    tpu.vector_store %arg15[%c0_35, %c8], %67 {strides = array<i32>} : memref<16x32xf32, #tpu.memory_space<vmem>>, vector<16x8xf32>,
    %69 = vector.extract_strided_slice %16 {offsets = [0, 2], sizes = [16, 1], strides = [1, 1]} : vector<16x4xf32> to vector<16x1xf32>
    %70 = vector.extract_strided_slice %20 {offsets = [2, 0], sizes = [1, 16], strides = [1, 1]} : vector<4x16xf32> to vector<1x16xf32>
    %71 = vector.broadcast %69 : vector<16x1xf32> to vector<16x16xf32>
    %72 = vector.broadcast %70 : vector<1x16xf32> to vector<16x16xf32>
    %73 = arith.addf %71, %72 : vector<16x16xf32>
    %cst_36 = arith.constant 0.000000e+00 : f32
    %74 = vector.broadcast %cst_36 : f32 to vector<16x16xf32>
    %75 = arith.cmpf ogt, %73, %74 : vector<16x16xf32>
    %cst_37 = arith.constant 2.000000e-01 : f32
    %76 = vector.broadcast %cst_37 : f32 to vector<16x16xf32>
    %77 = arith.mulf %76, %73 : vector<16x16xf32>
    %78 = arith.select %75, %73, %77 : vector<16x16xi1>, vector<16x16xf32>
    %79 = arith.addf %78, %6 : vector<16x16xf32>
    %cst_38 = arith.constant dense<0xFF800000> : vector<16xf32>
    %80 = vector.multi_reduction <maximumf>, %79, %cst_38 [1] : vector<16x16xf32> to vector<16xf32>
    %81 = vector.shape_cast %80 : vector<16xf32> to vector<16x1xf32>
    %82 = vector.broadcast %81 : vector<16x1xf32> to vector<16x16xf32>
    %83 = arith.subf %79, %82 : vector<16x16xf32>
    %84 = math.exp %83 : vector<16x16xf32>
    %cst_39 = arith.constant dense<0.000000e+00> : vector<16xf32>
    %85 = vector.multi_reduction <add>, %84, %cst_39 [1] : vector<16x16xf32> to vector<16xf32>
    %86 = vector.shape_cast %85 : vector<16xf32> to vector<16x1xf32>
    %87 = tpu.reciprocal %86 : vector<16x1xf32> -> vector<16x1xf32>
    %88 = vector.broadcast %87 : vector<16x1xf32> to vector<16x16xf32>
    %89 = arith.mulf %84, %88 : vector<16x16xf32>
    %90 = vector.extract_strided_slice %13 {offsets = [0, 16], sizes = [16, 8], strides = [1, 1]} : vector<16x32xf32> to vector<16x8xf32>
    %cst_40 = arith.constant dense<0.000000e+00> : vector<16x8xf32>
    %91 = tpu.matmul %89, %90, %cst_40 {dimension_numbers = #tpu.dot_dimension_numbers<[1], [0], [0], [1], [0, 0, 1, 1], [], []>} : vector<16x16xf32>, vector<16x8xf32>, vector<16x8xf32> -> vector<16x8xf32>
    %c0_41 = arith.constant 0 : index
    %c16 = arith.constant 16 : index
    %92 = vector.load %arg15[%c0_41, %c16] : memref<16x32xf32, #tpu.memory_space<vmem>>, vector<16x8xf32>
    tpu.vector_store %arg15[%c0_41, %c16], %91 {strides = array<i32>} : memref<16x32xf32, #tpu.memory_space<vmem>>, vector<16x8xf32>,
    %93 = vector.extract_strided_slice %16 {offsets = [0, 3], sizes = [16, 1], strides = [1, 1]} : vector<16x4xf32> to vector<16x1xf32>
    %94 = vector.extract_strided_slice %20 {offsets = [3, 0], sizes = [1, 16], strides = [1, 1]} : vector<4x16xf32> to vector<1x16xf32>
    %95 = vector.broadcast %93 : vector<16x1xf32> to vector<16x16xf32>
    %96 = vector.broadcast %94 : vector<1x16xf32> to vector<16x16xf32>
    %97 = arith.addf %95, %96 : vector<16x16xf32>
    %cst_42 = arith.constant 0.000000e+00 : f32
    %98 = vector.broadcast %cst_42 : f32 to vector<16x16xf32>
    %99 = arith.cmpf ogt, %97, %98 : vector<16x16xf32>
    %cst_43 = arith.constant 2.000000e-01 : f32
    %100 = vector.broadcast %cst_43 : f32 to vector<16x16xf32>
    %101 = arith.mulf %100, %97 : vector<16x16xf32>
    %102 = arith.select %99, %97, %101 : vector<16x16xi1>, vector<16x16xf32>
    %103 = arith.addf %102, %6 : vector<16x16xf32>
    %cst_44 = arith.constant dense<0xFF800000> : vector<16xf32>
    %104 = vector.multi_reduction <maximumf>, %103, %cst_44 [1] : vector<16x16xf32> to vector<16xf32>
    %105 = vector.shape_cast %104 : vector<16xf32> to vector<16x1xf32>
    %106 = vector.broadcast %105 : vector<16x1xf32> to vector<16x16xf32>
    %107 = arith.subf %103, %106 : vector<16x16xf32>
    %108 = math.exp %107 : vector<16x16xf32>
    %cst_45 = arith.constant dense<0.000000e+00> : vector<16xf32>
    %109 = vector.multi_reduction <add>, %108, %cst_45 [1] : vector<16x16xf32> to vector<16xf32>
    %110 = vector.shape_cast %109 : vector<16xf32> to vector<16x1xf32>
    %111 = tpu.reciprocal %110 : vector<16x1xf32> -> vector<16x1xf32>
    %112 = vector.broadcast %111 : vector<16x1xf32> to vector<16x16xf32>
    %113 = arith.mulf %108, %112 : vector<16x16xf32>
    %114 = vector.extract_strided_slice %13 {offsets = [0, 24], sizes = [16, 8], strides = [1, 1]} : vector<16x32xf32> to vector<16x8xf32>
    %cst_46 = arith.constant dense<0.000000e+00> : vector<16x8xf32>
    %115 = tpu.matmul %113, %114, %cst_46 {dimension_numbers = #tpu.dot_dimension_numbers<[1], [0], [0], [1], [0, 0, 1, 1], [], []>} : vector<16x16xf32>, vector<16x8xf32>, vector<16x8xf32> -> vector<16x8xf32>
    %c0_47 = arith.constant 0 : index
    %c24 = arith.constant 24 : index
    %116 = vector.load %arg15[%c0_47, %c24] : memref<16x32xf32, #tpu.memory_space<vmem>>, vector<16x8xf32>
    tpu.vector_store %arg15[%c0_47, %c24], %115 {strides = array<i32>} : memref<16x32xf32, #tpu.memory_space<vmem>>, vector<16x8xf32>,
    %c0_48 = arith.constant 0 : index
    %c0_49 = arith.constant 0 : index
    %117 = vector.load %arg15[%c0_48, %c0_49] : memref<16x32xf32, #tpu.memory_space<vmem>>, vector<16x32xf32>
    %c0_50 = arith.constant 0 : index
    %c0_51 = arith.constant 0 : index
    %c0_52 = arith.constant 0 : index
    %118 = vector.load %arg5[%c0_50, %c0_51, %c0_52] : memref<2x1x32xf32, #tpu.memory_space<vmem>>, vector<1x1x32xf32>
    %119 = vector.shape_cast %118 : vector<1x1x32xf32> to vector<1x32xf32>
    %120 = vector.broadcast %119 : vector<1x32xf32> to vector<16x32xf32>
    %121 = arith.addf %117, %120 : vector<16x32xf32>
    %122 = arith.addf %121, %0 : vector<16x32xf32>
    %cst_53 = arith.constant dense<0.000000e+00> : vector<16xf32>
    %123 = vector.multi_reduction <add>, %122, %cst_53 [1] : vector<16x32xf32> to vector<16xf32>
    %124 = vector.shape_cast %123 : vector<16xf32> to vector<16x1xf32>
    %cst_54 = arith.constant 3.200000e+01 : f32
    %125 = vector.broadcast %cst_54 : f32 to vector<16x1xf32>
    %126 = arith.divf %124, %125 : vector<16x1xf32>
    %127 = vector.broadcast %126 : vector<16x1xf32> to vector<16x32xf32>
    %128 = arith.subf %122, %127 : vector<16x32xf32>
    %129 = arith.mulf %128, %128 : vector<16x32xf32>
    %cst_55 = arith.constant dense<0.000000e+00> : vector<16xf32>
    %130 = vector.multi_reduction <add>, %129, %cst_55 [1] : vector<16x32xf32> to vector<16xf32>
    %131 = vector.shape_cast %130 : vector<16xf32> to vector<16x1xf32>
    %cst_56 = arith.constant 3.200000e+01 : f32
    %132 = vector.broadcast %cst_56 : f32 to vector<16x1xf32>
    %133 = arith.divf %131, %132 : vector<16x1xf32>
    %134 = vector.broadcast %126 : vector<16x1xf32> to vector<16x32xf32>
    %135 = arith.subf %122, %134 : vector<16x32xf32>
    %cst_57 = arith.constant 9.99999974E-6 : f32
    %136 = vector.broadcast %cst_57 : f32 to vector<16x1xf32>
    %137 = arith.addf %133, %136 : vector<16x1xf32>
    %138 = math.rsqrt %137 : vector<16x1xf32>
    %139 = vector.broadcast %138 : vector<16x1xf32> to vector<16x32xf32>
    %140 = arith.mulf %135, %139 : vector<16x32xf32>
    %141 = vector.broadcast %8 : vector<1x32xf32> to vector<16x32xf32>
    %142 = arith.mulf %140, %141 : vector<16x32xf32>
    %143 = vector.broadcast %10 : vector<1x32xf32> to vector<16x32xf32>
    %144 = arith.addf %142, %143 : vector<16x32xf32>
    %c0_58 = arith.constant 0 : index
    %c0_59 = arith.constant 0 : index
    %c0_60 = arith.constant 0 : index
    %145 = vector.load %arg8[%c0_58, %c0_59, %c0_60] : memref<2x32x64xf32, #tpu.memory_space<vmem>>, vector<1x32x64xf32>
    %146 = vector.shape_cast %145 : vector<1x32x64xf32> to vector<32x64xf32>
    %cst_61 = arith.constant dense<0.000000e+00> : vector<16x64xf32>
    %147 = tpu.matmul %144, %146, %cst_61 {dimension_numbers = #tpu.dot_dimension_numbers<[1], [0], [0], [1], [0, 0, 1, 1], [], []>} : vector<16x32xf32>, vector<32x64xf32>, vector<16x64xf32> -> vector<16x64xf32>
    %c0_62 = arith.constant 0 : index
    %c0_63 = arith.constant 0 : index
    %c0_64 = arith.constant 0 : index
    %148 = vector.load %arg9[%c0_62, %c0_63, %c0_64] : memref<2x1x64xf32, #tpu.memory_space<vmem>>, vector<1x1x64xf32>
    %149 = vector.shape_cast %148 : vector<1x1x64xf32> to vector<1x64xf32>
    %150 = vector.broadcast %149 : vector<1x64xf32> to vector<16x64xf32>
    %151 = arith.addf %147, %150 : vector<16x64xf32>
    %cst_65 = arith.constant 0.000000e+00 : f32
    %152 = vector.broadcast %cst_65 : f32 to vector<16x64xf32>
    %153 = arith.maximumf %151, %152 : vector<16x64xf32>
    %c0_66 = arith.constant 0 : index
    %c0_67 = arith.constant 0 : index
    %c0_68 = arith.constant 0 : index
    %154 = vector.load %arg10[%c0_66, %c0_67, %c0_68] : memref<2x64x32xf32, #tpu.memory_space<vmem>>, vector<1x64x32xf32>
    %155 = vector.shape_cast %154 : vector<1x64x32xf32> to vector<64x32xf32>
    %cst_69 = arith.constant dense<0.000000e+00> : vector<16x32xf32>
    %156 = tpu.matmul %153, %155, %cst_69 {dimension_numbers = #tpu.dot_dimension_numbers<[1], [0], [0], [1], [0, 0, 1, 1], [], []>} : vector<16x64xf32>, vector<64x32xf32>, vector<16x32xf32> -> vector<16x32xf32>
    %c0_70 = arith.constant 0 : index
    %c0_71 = arith.constant 0 : index
    %c0_72 = arith.constant 0 : index
    %157 = vector.load %arg11[%c0_70, %c0_71, %c0_72] : memref<2x1x32xf32, #tpu.memory_space<vmem>>, vector<1x1x32xf32>
    %158 = vector.shape_cast %157 : vector<1x1x32xf32> to vector<1x32xf32>
    %159 = vector.broadcast %158 : vector<1x32xf32> to vector<16x32xf32>
    %160 = arith.addf %156, %159 : vector<16x32xf32>
    %161 = arith.addf %144, %160 : vector<16x32xf32>
    %cst_73 = arith.constant dense<0.000000e+00> : vector<16xf32>
    %162 = vector.multi_reduction <add>, %161, %cst_73 [1] : vector<16x32xf32> to vector<16xf32>
    %163 = vector.shape_cast %162 : vector<16xf32> to vector<16x1xf32>
    %cst_74 = arith.constant 3.200000e+01 : f32
    %164 = vector.broadcast %cst_74 : f32 to vector<16x1xf32>
    %165 = arith.divf %163, %164 : vector<16x1xf32>
    %166 = vector.broadcast %165 : vector<16x1xf32> to vector<16x32xf32>
    %167 = arith.subf %161, %166 : vector<16x32xf32>
    %168 = arith.mulf %167, %167 : vector<16x32xf32>
    %cst_75 = arith.constant dense<0.000000e+00> : vector<16xf32>
    %169 = vector.multi_reduction <add>, %168, %cst_75 [1] : vector<16x32xf32> to vector<16xf32>
    %170 = vector.shape_cast %169 : vector<16xf32> to vector<16x1xf32>
    %cst_76 = arith.constant 3.200000e+01 : f32
    %171 = vector.broadcast %cst_76 : f32 to vector<16x1xf32>
    %172 = arith.divf %170, %171 : vector<16x1xf32>
    %173 = vector.broadcast %165 : vector<16x1xf32> to vector<16x32xf32>
    %174 = arith.subf %161, %173 : vector<16x32xf32>
    %cst_77 = arith.constant 9.99999974E-6 : f32
    %175 = vector.broadcast %cst_77 : f32 to vector<16x1xf32>
    %176 = arith.addf %172, %175 : vector<16x1xf32>
    %177 = math.rsqrt %176 : vector<16x1xf32>
    %178 = vector.broadcast %177 : vector<16x1xf32> to vector<16x32xf32>
    %179 = arith.mulf %174, %178 : vector<16x32xf32>
    %180 = vector.broadcast %8 : vector<1x32xf32> to vector<16x32xf32>
    %181 = arith.mulf %179, %180 : vector<16x32xf32>
    %182 = vector.broadcast %10 : vector<1x32xf32> to vector<16x32xf32>
    %183 = arith.addf %181, %182 : vector<16x32xf32>
    %c1 = arith.constant 1 : index
    %c0_78 = arith.constant 0 : index
    %c0_79 = arith.constant 0 : index
    %184 = vector.load %arg6[%c1, %c0_78, %c0_79] : memref<2x1x32xf32, #tpu.memory_space<vmem>>, vector<1x1x32xf32>
    %185 = vector.shape_cast %184 : vector<1x1x32xf32> to vector<1x32xf32>
    %c1_80 = arith.constant 1 : index
    %c0_81 = arith.constant 0 : index
    %c0_82 = arith.constant 0 : index
    %186 = vector.load %arg7[%c1_80, %c0_81, %c0_82] : memref<2x1x32xf32, #tpu.memory_space<vmem>>, vector<1x1x32xf32>
    %187 = vector.shape_cast %186 : vector<1x1x32xf32> to vector<1x32xf32>
    %c1_83 = arith.constant 1 : index
    %c0_84 = arith.constant 0 : index
    %c0_85 = arith.constant 0 : index
    %188 = vector.load %arg2[%c1_83, %c0_84, %c0_85] : memref<2x32x32xf32, #tpu.memory_space<vmem>>, vector<1x32x32xf32>
    %189 = vector.shape_cast %188 : vector<1x32x32xf32> to vector<32x32xf32>
    %cst_86 = arith.constant dense<0.000000e+00> : vector<16x32xf32>
    %190 = tpu.matmul %183, %189, %cst_86 {dimension_numbers = #tpu.dot_dimension_numbers<[1], [0], [0], [1], [0, 0, 1, 1], [], []>} : vector<16x32xf32>, vector<32x32xf32>, vector<16x32xf32> -> vector<16x32xf32>
    %c1_87 = arith.constant 1 : index
    %c0_88 = arith.constant 0 : index
    %c0_89 = arith.constant 0 : index
    %191 = vector.load %arg3[%c1_87, %c0_88, %c0_89] : memref<2x32x4xf32, #tpu.memory_space<vmem>>, vector<1x32x4xf32>
    %192 = vector.shape_cast %191 : vector<1x32x4xf32> to vector<32x4xf32>
    %cst_90 = arith.constant dense<0.000000e+00> : vector<16x4xf32>
    %193 = tpu.matmul %183, %192, %cst_90 {dimension_numbers = #tpu.dot_dimension_numbers<[1], [0], [0], [1], [0, 0, 1, 1], [], []>} : vector<16x32xf32>, vector<32x4xf32>, vector<16x4xf32> -> vector<16x4xf32>
    %c1_91 = arith.constant 1 : index
    %c0_92 = arith.constant 0 : index
    %c0_93 = arith.constant 0 : index
    %194 = vector.load %arg4[%c1_91, %c0_92, %c0_93] : memref<2x32x4xf32, #tpu.memory_space<vmem>>, vector<1x32x4xf32>
    %195 = vector.shape_cast %194 : vector<1x32x4xf32> to vector<32x4xf32>
    %cst_94 = arith.constant dense<0.000000e+00> : vector<16x4xf32>
    %196 = tpu.matmul %183, %195, %cst_94 {dimension_numbers = #tpu.dot_dimension_numbers<[1], [0], [0], [1], [0, 0, 1, 1], [], []>} : vector<16x32xf32>, vector<32x4xf32>, vector<16x4xf32> -> vector<16x4xf32>
    %197 = tpu.transpose %196, [1, 0] : vector<16x4xf32> -> vector<4x16xf32>
    %198 = vector.extract_strided_slice %193 {offsets = [0, 0], sizes = [16, 1], strides = [1, 1]} : vector<16x4xf32> to vector<16x1xf32>
    %199 = vector.extract_strided_slice %197 {offsets = [0, 0], sizes = [1, 16], strides = [1, 1]} : vector<4x16xf32> to vector<1x16xf32>
    %200 = vector.broadcast %198 : vector<16x1xf32> to vector<16x16xf32>
    %201 = vector.broadcast %199 : vector<1x16xf32> to vector<16x16xf32>
    %202 = arith.addf %200, %201 : vector<16x16xf32>
    %cst_95 = arith.constant 0.000000e+00 : f32
    %203 = vector.broadcast %cst_95 : f32 to vector<16x16xf32>
    %204 = arith.cmpf ogt, %202, %203 : vector<16x16xf32>
    %cst_96 = arith.constant 2.000000e-01 : f32
    %205 = vector.broadcast %cst_96 : f32 to vector<16x16xf32>
    %206 = arith.mulf %205, %202 : vector<16x16xf32>
    %207 = arith.select %204, %202, %206 : vector<16x16xi1>, vector<16x16xf32>
    %208 = arith.addf %207, %6 : vector<16x16xf32>
    %cst_97 = arith.constant dense<0xFF800000> : vector<16xf32>
    %209 = vector.multi_reduction <maximumf>, %208, %cst_97 [1] : vector<16x16xf32> to vector<16xf32>
    %210 = vector.shape_cast %209 : vector<16xf32> to vector<16x1xf32>
    %211 = vector.broadcast %210 : vector<16x1xf32> to vector<16x16xf32>
    %212 = arith.subf %208, %211 : vector<16x16xf32>
    %213 = math.exp %212 : vector<16x16xf32>
    %cst_98 = arith.constant dense<0.000000e+00> : vector<16xf32>
    %214 = vector.multi_reduction <add>, %213, %cst_98 [1] : vector<16x16xf32> to vector<16xf32>
    %215 = vector.shape_cast %214 : vector<16xf32> to vector<16x1xf32>
    %216 = tpu.reciprocal %215 : vector<16x1xf32> -> vector<16x1xf32>
    %217 = vector.broadcast %216 : vector<16x1xf32> to vector<16x16xf32>
    %218 = arith.mulf %213, %217 : vector<16x16xf32>
    %219 = vector.extract_strided_slice %190 {offsets = [0, 0], sizes = [16, 8], strides = [1, 1]} : vector<16x32xf32> to vector<16x8xf32>
    %cst_99 = arith.constant dense<0.000000e+00> : vector<16x8xf32>
    %220 = tpu.matmul %218, %219, %cst_99 {dimension_numbers = #tpu.dot_dimension_numbers<[1], [0], [0], [1], [0, 0, 1, 1], [], []>} : vector<16x16xf32>, vector<16x8xf32>, vector<16x8xf32> -> vector<16x8xf32>
    %c0_100 = arith.constant 0 : index
    %c0_101 = arith.constant 0 : index
    %221 = vector.load %arg15[%c0_100, %c0_101] : memref<16x32xf32, #tpu.memory_space<vmem>>, vector<16x8xf32>
    tpu.vector_store %arg15[%c0_100, %c0_101], %220 {strides = array<i32>} : memref<16x32xf32, #tpu.memory_space<vmem>>, vector<16x8xf32>,
    %222 = vector.extract_strided_slice %193 {offsets = [0, 1], sizes = [16, 1], strides = [1, 1]} : vector<16x4xf32> to vector<16x1xf32>
    %223 = vector.extract_strided_slice %197 {offsets = [1, 0], sizes = [1, 16], strides = [1, 1]} : vector<4x16xf32> to vector<1x16xf32>
    %224 = vector.broadcast %222 : vector<16x1xf32> to vector<16x16xf32>
    %225 = vector.broadcast %223 : vector<1x16xf32> to vector<16x16xf32>
    %226 = arith.addf %224, %225 : vector<16x16xf32>
    %cst_102 = arith.constant 0.000000e+00 : f32
    %227 = vector.broadcast %cst_102 : f32 to vector<16x16xf32>
    %228 = arith.cmpf ogt, %226, %227 : vector<16x16xf32>
    %cst_103 = arith.constant 2.000000e-01 : f32
    %229 = vector.broadcast %cst_103 : f32 to vector<16x16xf32>
    %230 = arith.mulf %229, %226 : vector<16x16xf32>
    %231 = arith.select %228, %226, %230 : vector<16x16xi1>, vector<16x16xf32>
    %232 = arith.addf %231, %6 : vector<16x16xf32>
    %cst_104 = arith.constant dense<0xFF800000> : vector<16xf32>
    %233 = vector.multi_reduction <maximumf>, %232, %cst_104 [1] : vector<16x16xf32> to vector<16xf32>
    %234 = vector.shape_cast %233 : vector<16xf32> to vector<16x1xf32>
    %235 = vector.broadcast %234 : vector<16x1xf32> to vector<16x16xf32>
    %236 = arith.subf %232, %235 : vector<16x16xf32>
    %237 = math.exp %236 : vector<16x16xf32>
    %cst_105 = arith.constant dense<0.000000e+00> : vector<16xf32>
    %238 = vector.multi_reduction <add>, %237, %cst_105 [1] : vector<16x16xf32> to vector<16xf32>
    %239 = vector.shape_cast %238 : vector<16xf32> to vector<16x1xf32>
    %240 = tpu.reciprocal %239 : vector<16x1xf32> -> vector<16x1xf32>
    %241 = vector.broadcast %240 : vector<16x1xf32> to vector<16x16xf32>
    %242 = arith.mulf %237, %241 : vector<16x16xf32>
    %243 = vector.extract_strided_slice %190 {offsets = [0, 8], sizes = [16, 8], strides = [1, 1]} : vector<16x32xf32> to vector<16x8xf32>
    %cst_106 = arith.constant dense<0.000000e+00> : vector<16x8xf32>
    %244 = tpu.matmul %242, %243, %cst_106 {dimension_numbers = #tpu.dot_dimension_numbers<[1], [0], [0], [1], [0, 0, 1, 1], [], []>} : vector<16x16xf32>, vector<16x8xf32>, vector<16x8xf32> -> vector<16x8xf32>
    %c0_107 = arith.constant 0 : index
    %c8_108 = arith.constant 8 : index
    %245 = vector.load %arg15[%c0_107, %c8_108] : memref<16x32xf32, #tpu.memory_space<vmem>>, vector<16x8xf32>
    tpu.vector_store %arg15[%c0_107, %c8_108], %244 {strides = array<i32>} : memref<16x32xf32, #tpu.memory_space<vmem>>, vector<16x8xf32>,
    %246 = vector.extract_strided_slice %193 {offsets = [0, 2], sizes = [16, 1], strides = [1, 1]} : vector<16x4xf32> to vector<16x1xf32>
    %247 = vector.extract_strided_slice %197 {offsets = [2, 0], sizes = [1, 16], strides = [1, 1]} : vector<4x16xf32> to vector<1x16xf32>
    %248 = vector.broadcast %246 : vector<16x1xf32> to vector<16x16xf32>
    %249 = vector.broadcast %247 : vector<1x16xf32> to vector<16x16xf32>
    %250 = arith.addf %248, %249 : vector<16x16xf32>
    %cst_109 = arith.constant 0.000000e+00 : f32
    %251 = vector.broadcast %cst_109 : f32 to vector<16x16xf32>
    %252 = arith.cmpf ogt, %250, %251 : vector<16x16xf32>
    %cst_110 = arith.constant 2.000000e-01 : f32
    %253 = vector.broadcast %cst_110 : f32 to vector<16x16xf32>
    %254 = arith.mulf %253, %250 : vector<16x16xf32>
    %255 = arith.select %252, %250, %254 : vector<16x16xi1>, vector<16x16xf32>
    %256 = arith.addf %255, %6 : vector<16x16xf32>
    %cst_111 = arith.constant dense<0xFF800000> : vector<16xf32>
    %257 = vector.multi_reduction <maximumf>, %256, %cst_111 [1] : vector<16x16xf32> to vector<16xf32>
    %258 = vector.shape_cast %257 : vector<16xf32> to vector<16x1xf32>
    %259 = vector.broadcast %258 : vector<16x1xf32> to vector<16x16xf32>
    %260 = arith.subf %256, %259 : vector<16x16xf32>
    %261 = math.exp %260 : vector<16x16xf32>
    %cst_112 = arith.constant dense<0.000000e+00> : vector<16xf32>
    %262 = vector.multi_reduction <add>, %261, %cst_112 [1] : vector<16x16xf32> to vector<16xf32>
    %263 = vector.shape_cast %262 : vector<16xf32> to vector<16x1xf32>
    %264 = tpu.reciprocal %263 : vector<16x1xf32> -> vector<16x1xf32>
    %265 = vector.broadcast %264 : vector<16x1xf32> to vector<16x16xf32>
    %266 = arith.mulf %261, %265 : vector<16x16xf32>
    %267 = vector.extract_strided_slice %190 {offsets = [0, 16], sizes = [16, 8], strides = [1, 1]} : vector<16x32xf32> to vector<16x8xf32>
    %cst_113 = arith.constant dense<0.000000e+00> : vector<16x8xf32>
    %268 = tpu.matmul %266, %267, %cst_113 {dimension_numbers = #tpu.dot_dimension_numbers<[1], [0], [0], [1], [0, 0, 1, 1], [], []>} : vector<16x16xf32>, vector<16x8xf32>, vector<16x8xf32> -> vector<16x8xf32>
    %c0_114 = arith.constant 0 : index
    %c16_115 = arith.constant 16 : index
    %269 = vector.load %arg15[%c0_114, %c16_115] : memref<16x32xf32, #tpu.memory_space<vmem>>, vector<16x8xf32>
    tpu.vector_store %arg15[%c0_114, %c16_115], %268 {strides = array<i32>} : memref<16x32xf32, #tpu.memory_space<vmem>>, vector<16x8xf32>,
    %270 = vector.extract_strided_slice %193 {offsets = [0, 3], sizes = [16, 1], strides = [1, 1]} : vector<16x4xf32> to vector<16x1xf32>
    %271 = vector.extract_strided_slice %197 {offsets = [3, 0], sizes = [1, 16], strides = [1, 1]} : vector<4x16xf32> to vector<1x16xf32>
    %272 = vector.broadcast %270 : vector<16x1xf32> to vector<16x16xf32>
    %273 = vector.broadcast %271 : vector<1x16xf32> to vector<16x16xf32>
    %274 = arith.addf %272, %273 : vector<16x16xf32>
    %cst_116 = arith.constant 0.000000e+00 : f32
    %275 = vector.broadcast %cst_116 : f32 to vector<16x16xf32>
    %276 = arith.cmpf ogt, %274, %275 : vector<16x16xf32>
    %cst_117 = arith.constant 2.000000e-01 : f32
    %277 = vector.broadcast %cst_117 : f32 to vector<16x16xf32>
    %278 = arith.mulf %277, %274 : vector<16x16xf32>
    %279 = arith.select %276, %274, %278 : vector<16x16xi1>, vector<16x16xf32>
    %280 = arith.addf %279, %6 : vector<16x16xf32>
    %cst_118 = arith.constant dense<0xFF800000> : vector<16xf32>
    %281 = vector.multi_reduction <maximumf>, %280, %cst_118 [1] : vector<16x16xf32> to vector<16xf32>
    %282 = vector.shape_cast %281 : vector<16xf32> to vector<16x1xf32>
    %283 = vector.broadcast %282 : vector<16x1xf32> to vector<16x16xf32>
    %284 = arith.subf %280, %283 : vector<16x16xf32>
    %285 = math.exp %284 : vector<16x16xf32>
    %cst_119 = arith.constant dense<0.000000e+00> : vector<16xf32>
    %286 = vector.multi_reduction <add>, %285, %cst_119 [1] : vector<16x16xf32> to vector<16xf32>
    %287 = vector.shape_cast %286 : vector<16xf32> to vector<16x1xf32>
    %288 = tpu.reciprocal %287 : vector<16x1xf32> -> vector<16x1xf32>
    %289 = vector.broadcast %288 : vector<16x1xf32> to vector<16x16xf32>
    %290 = arith.mulf %285, %289 : vector<16x16xf32>
    %291 = vector.extract_strided_slice %190 {offsets = [0, 24], sizes = [16, 8], strides = [1, 1]} : vector<16x32xf32> to vector<16x8xf32>
    %cst_120 = arith.constant dense<0.000000e+00> : vector<16x8xf32>
    %292 = tpu.matmul %290, %291, %cst_120 {dimension_numbers = #tpu.dot_dimension_numbers<[1], [0], [0], [1], [0, 0, 1, 1], [], []>} : vector<16x16xf32>, vector<16x8xf32>, vector<16x8xf32> -> vector<16x8xf32>
    %c0_121 = arith.constant 0 : index
    %c24_122 = arith.constant 24 : index
    %293 = vector.load %arg15[%c0_121, %c24_122] : memref<16x32xf32, #tpu.memory_space<vmem>>, vector<16x8xf32>
    tpu.vector_store %arg15[%c0_121, %c24_122], %292 {strides = array<i32>} : memref<16x32xf32, #tpu.memory_space<vmem>>, vector<16x8xf32>,
    %c0_123 = arith.constant 0 : index
    %c0_124 = arith.constant 0 : index
    %294 = vector.load %arg15[%c0_123, %c0_124] : memref<16x32xf32, #tpu.memory_space<vmem>>, vector<16x32xf32>
    %c1_125 = arith.constant 1 : index
    %c0_126 = arith.constant 0 : index
    %c0_127 = arith.constant 0 : index
    %295 = vector.load %arg5[%c1_125, %c0_126, %c0_127] : memref<2x1x32xf32, #tpu.memory_space<vmem>>, vector<1x1x32xf32>
    %296 = vector.shape_cast %295 : vector<1x1x32xf32> to vector<1x32xf32>
    %297 = vector.broadcast %296 : vector<1x32xf32> to vector<16x32xf32>
    %298 = arith.addf %294, %297 : vector<16x32xf32>
    %299 = arith.addf %298, %183 : vector<16x32xf32>
    %cst_128 = arith.constant dense<0.000000e+00> : vector<16xf32>
    %300 = vector.multi_reduction <add>, %299, %cst_128 [1] : vector<16x32xf32> to vector<16xf32>
    %301 = vector.shape_cast %300 : vector<16xf32> to vector<16x1xf32>
    %cst_129 = arith.constant 3.200000e+01 : f32
    %302 = vector.broadcast %cst_129 : f32 to vector<16x1xf32>
    %303 = arith.divf %301, %302 : vector<16x1xf32>
    %304 = vector.broadcast %303 : vector<16x1xf32> to vector<16x32xf32>
    %305 = arith.subf %299, %304 : vector<16x32xf32>
    %306 = arith.mulf %305, %305 : vector<16x32xf32>
    %cst_130 = arith.constant dense<0.000000e+00> : vector<16xf32>
    %307 = vector.multi_reduction <add>, %306, %cst_130 [1] : vector<16x32xf32> to vector<16xf32>
    %308 = vector.shape_cast %307 : vector<16xf32> to vector<16x1xf32>
    %cst_131 = arith.constant 3.200000e+01 : f32
    %309 = vector.broadcast %cst_131 : f32 to vector<16x1xf32>
    %310 = arith.divf %308, %309 : vector<16x1xf32>
    %311 = vector.broadcast %303 : vector<16x1xf32> to vector<16x32xf32>
    %312 = arith.subf %299, %311 : vector<16x32xf32>
    %cst_132 = arith.constant 9.99999974E-6 : f32
    %313 = vector.broadcast %cst_132 : f32 to vector<16x1xf32>
    %314 = arith.addf %310, %313 : vector<16x1xf32>
    %315 = math.rsqrt %314 : vector<16x1xf32>
    %316 = vector.broadcast %315 : vector<16x1xf32> to vector<16x32xf32>
    %317 = arith.mulf %312, %316 : vector<16x32xf32>
    %318 = vector.broadcast %185 : vector<1x32xf32> to vector<16x32xf32>
    %319 = arith.mulf %317, %318 : vector<16x32xf32>
    %320 = vector.broadcast %187 : vector<1x32xf32> to vector<16x32xf32>
    %321 = arith.addf %319, %320 : vector<16x32xf32>
    %c1_133 = arith.constant 1 : index
    %c0_134 = arith.constant 0 : index
    %c0_135 = arith.constant 0 : index
    %322 = vector.load %arg8[%c1_133, %c0_134, %c0_135] : memref<2x32x64xf32, #tpu.memory_space<vmem>>, vector<1x32x64xf32>
    %323 = vector.shape_cast %322 : vector<1x32x64xf32> to vector<32x64xf32>
    %cst_136 = arith.constant dense<0.000000e+00> : vector<16x64xf32>
    %324 = tpu.matmul %321, %323, %cst_136 {dimension_numbers = #tpu.dot_dimension_numbers<[1], [0], [0], [1], [0, 0, 1, 1], [], []>} : vector<16x32xf32>, vector<32x64xf32>, vector<16x64xf32> -> vector<16x64xf32>
    %c1_137 = arith.constant 1 : index
    %c0_138 = arith.constant 0 : index
    %c0_139 = arith.constant 0 : index
    %325 = vector.load %arg9[%c1_137, %c0_138, %c0_139] : memref<2x1x64xf32, #tpu.memory_space<vmem>>, vector<1x1x64xf32>
    %326 = vector.shape_cast %325 : vector<1x1x64xf32> to vector<1x64xf32>
    %327 = vector.broadcast %326 : vector<1x64xf32> to vector<16x64xf32>
    %328 = arith.addf %324, %327 : vector<16x64xf32>
    %cst_140 = arith.constant 0.000000e+00 : f32
    %329 = vector.broadcast %cst_140 : f32 to vector<16x64xf32>
    %330 = arith.maximumf %328, %329 : vector<16x64xf32>
    %c1_141 = arith.constant 1 : index
    %c0_142 = arith.constant 0 : index
    %c0_143 = arith.constant 0 : index
    %331 = vector.load %arg10[%c1_141, %c0_142, %c0_143] : memref<2x64x32xf32, #tpu.memory_space<vmem>>, vector<1x64x32xf32>
    %332 = vector.shape_cast %331 : vector<1x64x32xf32> to vector<64x32xf32>
    %cst_144 = arith.constant dense<0.000000e+00> : vector<16x32xf32>
    %333 = tpu.matmul %330, %332, %cst_144 {dimension_numbers = #tpu.dot_dimension_numbers<[1], [0], [0], [1], [0, 0, 1, 1], [], []>} : vector<16x64xf32>, vector<64x32xf32>, vector<16x32xf32> -> vector<16x32xf32>
    %c1_145 = arith.constant 1 : index
    %c0_146 = arith.constant 0 : index
    %c0_147 = arith.constant 0 : index
    %334 = vector.load %arg11[%c1_145, %c0_146, %c0_147] : memref<2x1x32xf32, #tpu.memory_space<vmem>>, vector<1x1x32xf32>
    %335 = vector.shape_cast %334 : vector<1x1x32xf32> to vector<1x32xf32>
    %336 = vector.broadcast %335 : vector<1x32xf32> to vector<16x32xf32>
    %337 = arith.addf %333, %336 : vector<16x32xf32>
    %338 = arith.addf %321, %337 : vector<16x32xf32>
    %cst_148 = arith.constant dense<0.000000e+00> : vector<16xf32>
    %339 = vector.multi_reduction <add>, %338, %cst_148 [1] : vector<16x32xf32> to vector<16xf32>
    %340 = vector.shape_cast %339 : vector<16xf32> to vector<16x1xf32>
    %cst_149 = arith.constant 3.200000e+01 : f32
    %341 = vector.broadcast %cst_149 : f32 to vector<16x1xf32>
    %342 = arith.divf %340, %341 : vector<16x1xf32>
    %343 = vector.broadcast %342 : vector<16x1xf32> to vector<16x32xf32>
    %344 = arith.subf %338, %343 : vector<16x32xf32>
    %345 = arith.mulf %344, %344 : vector<16x32xf32>
    %cst_150 = arith.constant dense<0.000000e+00> : vector<16xf32>
    %346 = vector.multi_reduction <add>, %345, %cst_150 [1] : vector<16x32xf32> to vector<16xf32>
    %347 = vector.shape_cast %346 : vector<16xf32> to vector<16x1xf32>
    %cst_151 = arith.constant 3.200000e+01 : f32
    %348 = vector.broadcast %cst_151 : f32 to vector<16x1xf32>
    %349 = arith.divf %347, %348 : vector<16x1xf32>
    %350 = vector.broadcast %342 : vector<16x1xf32> to vector<16x32xf32>
    %351 = arith.subf %338, %350 : vector<16x32xf32>
    %cst_152 = arith.constant 9.99999974E-6 : f32
    %352 = vector.broadcast %cst_152 : f32 to vector<16x1xf32>
    %353 = arith.addf %349, %352 : vector<16x1xf32>
    %354 = math.rsqrt %353 : vector<16x1xf32>
    %355 = vector.broadcast %354 : vector<16x1xf32> to vector<16x32xf32>
    %356 = arith.mulf %351, %355 : vector<16x32xf32>
    %357 = vector.broadcast %185 : vector<1x32xf32> to vector<16x32xf32>
    %358 = arith.mulf %356, %357 : vector<16x32xf32>
    %359 = vector.broadcast %187 : vector<1x32xf32> to vector<16x32xf32>
    %360 = arith.addf %358, %359 : vector<16x32xf32>
    %c0_153 = arith.constant 0 : index
    %c0_154 = arith.constant 0 : index
    %361 = vector.load %arg12[%c0_153, %c0_154] : memref<32x8xf32, #tpu.memory_space<vmem>>, vector<32x8xf32>
    %cst_155 = arith.constant dense<0.000000e+00> : vector<16x8xf32>
    %362 = tpu.matmul %360, %361, %cst_155 {dimension_numbers = #tpu.dot_dimension_numbers<[1], [0], [0], [1], [0, 0, 1, 1], [], []>} : vector<16x32xf32>, vector<32x8xf32>, vector<16x8xf32> -> vector<16x8xf32>
    %c0_156 = arith.constant 0 : index
    %c0_157 = arith.constant 0 : index
    %363 = vector.load %arg13[%c0_156, %c0_157] : memref<1x8xf32, #tpu.memory_space<vmem>>, vector<1x8xf32>
    %364 = vector.broadcast %363 : vector<1x8xf32> to vector<16x8xf32>
    %365 = arith.addf %362, %364 : vector<16x8xf32>
    %c0_158 = arith.constant 0 : index
    %c0_159 = arith.constant 0 : index
    %366 = vector.load %arg14[%c0_158, %c0_159] : memref<16x8xf32, #tpu.memory_space<vmem>>, vector<16x8xf32>
    tpu.vector_store %arg14[%c0_158, %c0_159], %365 {strides = array<i32>} : memref<16x8xf32, #tpu.memory_space<vmem>>, vector<16x8xf32>,
    return
  }
}

</mosaic_0001>

<bundles_post_ra>
// kernel: tpu_custom_call.1
= control target key start
LH: loop header
LB: loop body
LE: loop exit
PB: predicated region body
PF: predicated region fallthrough
CT: control target
= control target key end

     0   :  { %vm61_vm0 = vcmask 261120   ;;  %v3038_v3 = vmov 1   ;;  %v3039_v4 = vmov 0   ;;  %v3040_v28 = vmov 2   ;;  %s3044_s28 = smov 104   ;;  %s3045_s29 = smov 112   ;;  %s3613_s3 = inlined_call_operand.vmem [shape: f32[2,32,4], index: 3, kind: input, shape index: {}]   ;;  %s3614_s0 = inlined_call_operand.vmem [shape: f32[16,32], index: 0, kind: input, shape index: {}]   ;;  %s3615_s2 = inlined_call_operand.vmem [shape: f32[2,32,32], index: 2, kind: input, shape index: {}]   ;;  %s3616_s4 = inlined_call_operand.vmem [shape: f32[2,32,4], index: 4, kind: input, shape index: {}]   ;;  %s3617_s1 = inlined_call_operand.vmem [shape: f32[16,16], index: 1, kind: input, shape index: {}]   ;;  %s3618_s5 = inlined_call_operand.vmem [shape: f32[2,1,32], index: 5, kind: input, shape index: {}]   ;;  %s3619_s8 = inlined_call_operand.vmem [shape: f32[2,32,64], index: 8, kind: input, shape index: {}]   ;;  %s3620_s10 = inlined_call_operand.vmem [shape: f32[2,64,32], index: 10, kind: input, shape index: {}]   ;;  %s3621_s6 = inlined_call_operand.vmem [shape: f32[2,1,32], index: 6, kind: input, shape index: {}]   ;;  %s3622_s7 = inlined_call_operand.vmem [shape: f32[2,1,32], index: 7, kind: input, shape index: {}]   ;;  %s3623_s9 = inlined_call_operand.vmem [shape: f32[2,1,64], index: 9, kind: input, shape index: {}]   ;;  %s3624_s11 = inlined_call_operand.vmem [shape: f32[2,1,32], index: 11, kind: input, shape index: {}]   ;;  %s3625_s12 = inlined_call_operand.vmem [shape: f32[32,8], index: 12, kind: input, shape index: {}]   ;;  %s3626_s13 = inlined_call_operand.vmem [shape: f32[1,8], index: 13, kind: input, shape index: {}]   ;;  %s3627_s14 = inlined_call_operand.vmem [shape: f32[16,8], index: 14, kind: output, shape index: {}]  }
   0x1   :  { %v143_v0 = vld [vmem:[%s3613_s3] sm:$0xff]  ;;  %v144_v1 = vld [vmem:[%s3613_s3 + $0x8] sm:$0xff]  ;;  %v145_v2 = vld [vmem:[%s3613_s3 + $0x10] sm:$0xff]  ;;  %2913 = vset.pattern.permute.xlu1 %v3038_v3  ;;  %2912 = vset.pattern.permute.xlu0 %v3039_v4  ;;  %v3041_v31 = vmov 3   ;;  %v343_v34 = vlaneseq  ;;  %v3042_v54 = vmov -1e+09  }
   0x2   :  { %v2772_v5 = vpack.c.bf16 %v144_v1, %v143_v0  ;;  %v146_v6 = vld [vmem:[%s3613_s3 + $0x18] sm:$0xff]  ;;  %v3141_v7 = vld [vmem:[%s3614_s0] sm:$0xff]  ;;  %v58_v10 = vld [vmem:[%s3615_s2 + $0x8] sm:$0xff]  ;;  %vm357_vm4 = vcmask 130048   ;;  %vm461_vm12 = vcmask 64512   ;;  %s3046_s30 = smov 16  }
   0x3   :  { %v2776_v8 = vpack.c.bf16 %v146_v6, %v145_v2  ;;  %2590 = vmatprep.mubr.msk.f32.mxu1 %vm61_vm0, %v3141_v7  ;;  %v57_v9 = vld [vmem:[%s3615_s2] sm:$0xff]  ;;  %v59_v11 = vld [vmem:[%s3615_s2 + $0x10] sm:$0xff]  ;;  %2579 = vmatprep.mubr.msk.f32.mxu0 %vm61_vm0, %v3141_v7  ;;  %v60_v13 = vld [vmem:[%s3615_s2 + $0x18] sm:$0xff]  ;;  %v3193_v36 = vshrl.u32 %v343_v34, 7  ;;  %s3047_s15 = smov 8   ;;  %s3048_s16 = smov 24  }
   0x4   :  { %2773 = vmatprep.subr.bf16.mxu1 %v2772_v5  ;;  %v2764_v12 = vpack.c.bf16 %v58_v10, %v57_v9  ;;  %v2768_v14 = vpack.c.bf16 %v60_v13, %v59_v11  ;;  %v222_v15 = vld [vmem:[%s3616_s4] sm:$0xff]  ;;  %v223_v16 = vld [vmem:[%s3616_s4 + $0x8] sm:$0xff]  ;;  %v224_v19 = vld [vmem:[%s3616_s4 + $0x10] sm:$0xff]  ;;  %vm605_vm13 = vcmask 130112   ;;  %vm747_vm14 = vcmask 195712  }
   0x5   :  { %2775 = vmatpush3.bf16.msra.mxu1 %v2772_v5  ;;  %v2780_v17 = vpack.c.bf16 %v223_v16, %v222_v15  ;;  %v3168_v18 = vld [vmem:[%s3614_s0 + $0x8] sm:$0xff]  ;;  %v225_v20 = vld [vmem:[%s3616_s4 + $0x18] sm:$0xff]  ;;  %v345_v39 = vsub.s32 0, %v3193_v36  ;;  %v474_v40 = vsub.s32 1, %v3193_v36  ;;  %v618_v41 = vsub.s32 2, %v3193_v36  ;;  %v49_v51 = vld [vmem:[%s3617_s1] sm:$0xff] }
   0x6   :  { %2777 = vmatprep.subr.bf16.mxu1 %v2776_v8  ;;  %2765 = vmatprep.subr.bf16.mxu0 %v2764_v12  ;;  %v2784_v21 = vpack.c.bf16 %v225_v20, %v224_v19  ;;  %v50_v42 = vld [vmem:[%s3617_s1 + $0x8] sm:$0xff]  ;;  %v760_v52 = vsub.s32 3, %v3193_v36  ;;  %vm51_vm6 = vcmp.gt.f32.partialorder %v49_v51, 0.0  ;;  %s3043_s1 = smov 120   ;;  %vm889_vm15 = vcmask 261312  }
   0x7   :  { %2767 = vmatpush3.bf16.msra.mxu0 %v2764_v12  ;;  %vm52_vm1 = vcmp.gt.f32.partialorder %v50_v42, 0.0 }
   0x8   :  { %2769 = vmatprep.subr.bf16.mxu0 %v2768_v14  ;;  %v3211_v55 = vsel %vm52_vm1, 0.0, %v3042_v54  ;;  %vm1057_vm1 = vcmask 523264  }
   0x9   :  { %2779 = vmatpush3.bf16.msra.mxu1 %v2776_v8  ;;  %v3218_v8 = vsel %vm51_vm6, 0.0, %v3042_v54 }
   0xb   :  { %2771 = vmatpush3.bf16.msra.mxu0 %v2768_v14 }
   0xc   :  { %2591 = vmatmul.mubr.msk.f32.vlgmr.msra.gmra.mrb[0].mxu1 %vm61_vm0, %v3168_v18  ;;  %2781 = vmatprep.subr.bf16.mxu0 %v2780_v17 }
   0xe   :  { %2580 = vmatmul.mubr.msk.f32.vlgmr.msra.gmra.mrb[0].mxu0 %vm61_vm0, %v3168_v18 }
   0xf   :  { %2783 = vmatpush3.bf16.msra.mxu0 %v2780_v17  ;;  %2601 = vmatprep.mubr.msk.f32.mxu0 %vm61_vm0, %v3141_v7 }
  0x10   :  { %2785 = vmatprep.subr.bf16.mxu0 %v2784_v21 }
  0x13   :  { %2787 = vmatpush3.bf16.msra.mxu0 %v2784_v21 }
  0x16   :  { %2602 = vmatmul.mubr.msk.f32.vlgmr.msra.gmra.mrb[2].mxu0 %vm61_vm0, %v3168_v18 }
  0xdf   :  { %v2592_v22 = vpop.f32.mrb[0].mxu1 }
  0xe0   :  { %469 = vperm.xlu1 %2913, %v2592_v22   ;;  %340 = vperm.xlu0 %2912, %v2592_v22   ;;  %v213_v23 = vpop.f32.mrb[1].mxu1 }
  0xe1   :  { %v2581_v24 = vpop.f32.mrb[0].mxu0 }
  0xe2   :  { %v134_v25 = vpop.f32.mrb[1].mxu0 }
  0xe3   :  { %v2788_v26 = vpack.c.bf16 %v2581_v24, %v134_v25  ;;  %v3184_v27 = vpack.i.bf16 %v2581_v24, %v134_v25 }
  0xe4   :  { %2914 = vset.pattern.permute.xlu1 %v3040_v28  ;;  %335 = vperm.xlu0 %2912, %v213_v23  }
  0xe5   :  { %613 = vperm.xlu1 %2914, %v2592_v22   ;;  %2789 = vmatprep.subr.bf16.mxu1 %v2788_v26 }
  0xe6   :  { %2791 = vmatpush3.bf16.msra.mxu1 %v2788_v26 }
  0xe8   :  { %2916 = vset.pattern.permute.xlu0 %v3040_v28 }
  0xe9   :  { %2915 = vset.pattern.permute.xlu1 %v3038_v3  ;;  %609 = vperm.xlu0 %2916, %v213_v23   ;;  %v2603_v29 = vpop.f32.mrb[2].mxu0 }
  0xea   :  { %465 = vperm.xlu1 %2915, %v213_v23   ;;  %v292_v30 = vpop.f32.mrb[3].mxu0 }
  0xed   :  { %2917 = vset.pattern.permute.xlu0 %v3041_v31 }
  0xee   :  { %2918 = vset.pattern.permute.xlu1 %v3041_v31  ;;  %755 = vperm.xlu0 %2917, %v2592_v22  }
  0xef   :  { %751 = vperm.xlu1 %2918, %v213_v23  }
  0xf2   :  { %2934 = vset.pattern.permute.xlu0 %v3039_v4 }
 0x118   :  { %301 = vxpose.xlu1.b32.start [1/2] (short) (narrow) %v292_v30, 8 }
 0x11c   :  { %302 = vxpose.xlu1.b32.end [2/2] (short) (narrow) %v2603_v29, 8 }
 0x13a   :  { %2935 = vset.pattern.permute.xlu1 %v3039_v4 }
 0x15f   :  { %v470_v32 = vpop.permute.xlu1 %469  ;;  %v341_v37 = vpop.permute.xlu0 %340 }
 0x163   :  { %v336_v47 = vpop.permute.xlu0 %335 }
 0x164   :  { %v614_v33 = vpop.permute.xlu1 %613 }
 0x168   :  { %v610_v2 = vpop.permute.xlu0 %609 }
 0x169   :  { %v466_v35 = vpop.permute.xlu1 %465 }
 0x16d   :  { %v756_v19 = vpop.permute.xlu0 %755 }
 0x16e   :  { %v752_v38 = vpop.permute.xlu1 %751 }
 0x198   :  { %v317_v43 = vpop.trf.xlu1 }
 0x199   :  { %v346_v44 = vrot.slane %v317_v43, %v345_v39  ;;  %v475_v45 = vrot.slane %v317_v43, %v474_v40  ;;  %v619_v46 = vrot.slane %v317_v43, %v618_v41  ;;  %v761_v10 = vrot.slane %v317_v43, %v760_v52 }
 0x19b   :  { %v347_v48 = vadd.f32 %v346_v44, %v336_v47  ;;  %v348_v49 = vadd.f32 %v346_v44, %v341_v37  ;;  %v477_v50 = vadd.f32 %v475_v45, %v470_v32  ;;  %v621_v53 = vadd.f32 %v619_v46, %v614_v33 }
 0x19c   :  { %v476_v59 = vadd.f32 %v475_v45, %v466_v35  ;;  %v620_v9 = vadd.f32 %v619_v46, %v610_v2  ;;  %v762_v15 = vadd.f32 %v761_v10, %v752_v38  ;;  %v763_v22 = vadd.f32 %v761_v10, %v756_v19 }
 0x19d   :  { %vm479_vm2 = vcmp.gt.f32.partialorder %v477_v50, 0.0  ;;  %v481_v56 = vmul.f32 0.2, %v477_v50  ;;  %vm350_vm3 = vcmp.gt.f32.partialorder %v348_v49, 0.0  ;;  %v352_v57 = vmul.f32 0.2, %v348_v49 }
 0x19e   :  { %vm623_vm5 = vcmp.gt.f32.partialorder %v621_v53, 0.0  ;;  %v625_v58 = vmul.f32 0.2, %v621_v53  ;;  %v351_v62 = vmul.f32 0.2, %v347_v48  ;;  %vm349_vm7 = vcmp.gt.f32.partialorder %v347_v48, 0.0 }
 0x19f   :  { %v483_v60 = vsel %vm479_vm2, %v477_v50, %v481_v56  ;;  %v354_v61 = vsel %vm350_vm3, %v348_v49, %v352_v57  ;;  %v480_v12 = vmul.f32 0.2, %v476_v59  ;;  %vm478_vm8 = vcmp.gt.f32.partialorder %v476_v59, 0.0 }
 0x1a0   :  { %v485_v63 = vadd.f32 %v483_v60, %v3211_v55  ;;  %v356_v0 = vadd.f32 %v354_v61, %v3211_v55  ;;  %v627_v1 = vsel %vm623_vm5, %v621_v53, %v625_v58  ;;  %v353_v11 = vsel %vm349_vm7, %v347_v48, %v351_v62 }
 0x1a1   :  { %v629_v6 = vadd.f32 %v627_v1, %v3211_v55  ;;  %v3224_v14 = vadd.f32 %v353_v11, %v3218_v8  ;;  %v482_v16 = vsel %vm478_vm8, %v476_v59, %v480_v12  ;;  %v624_v17 = vmul.f32 0.2, %v620_v9 }
 0x1a2   :  { %v489_v4 = vsel %vm357_vm4, %v485_v63, -inf  ;;  %v361_v5 = vsel %vm357_vm4, %v356_v0, -inf  ;;  %vm622_vm9 = vcmp.gt.f32.partialorder %v620_v9, 0.0  ;;  %v3229_v21 = vadd.f32 %v482_v16, %v3218_v8 }
 0x1a3   :  { %490 = vmax.xlane.f32.xlu1 %v489_v4  ;;  %362 = vmax.xlane.f32.xlu0 %v361_v5  ;;  %v633_v13 = vsel %vm357_vm4, %v629_v6, -inf  ;;  %v358_v20 = vsel %vm357_vm4, %v3224_v14, -inf  ;;  %v626_v23 = vsel %vm622_vm9, %v620_v9, %v624_v17  ;;  %v766_v24 = vmul.f32 0.2, %v762_v15 }
 0x1a4   :  { %vm764_vm10 = vcmp.gt.f32.partialorder %v762_v15, 0.0  ;;  %v486_v25 = vsel %vm357_vm4, %v3229_v21, -inf  ;;  %v628_v26 = vadd.f32 %v626_v23, %v3218_v8  ;;  %v767_v30 = vmul.f32 0.2, %v763_v22 }
 0x1a5   :  { %v768_v29 = vsel %vm764_vm10, %v762_v15, %v766_v24  ;;  %vm765_vm11 = vcmp.gt.f32.partialorder %v763_v22, 0.0 }
 0x1a6   :  { %v630_v32 = vsel %vm357_vm4, %v628_v26, -inf  ;;  %v770_v33 = vadd.f32 %v768_v29, %v3218_v8  ;;  %v769_v34 = vsel %vm765_vm11, %v763_v22, %v767_v30 }
 0x1a7   :  { %634 = vmax.xlane.f32.xlu0 %v633_v13  ;;  %v771_v37 = vadd.f32 %v769_v34, %v3211_v55 }
 0x1a8   :  { %v772_v35 = vsel %vm357_vm4, %v770_v33, -inf }
 0x1a9   :  { %v775_v38 = vsel %vm357_vm4, %v771_v37, -inf }
 0x1ab   :  { %359 = vmax.xlane.f32.xlu0 %v358_v20 }
 0x1af   :  { %487 = vmax.xlane.f32.xlu0 %v486_v25 }
 0x1b3   :  { %631 = vmax.xlane.f32.xlu0 %v630_v32 }
 0x1b4   :  { %2920 = vrot.lane.b32.xlu1 %v3184_v27, %s3043_s1 }
 0x1b7   :  { %773 = vmax.xlane.f32.xlu0 %v772_v35 }
 0x1bb   :  { %776 = vmax.xlane.f32.xlu0 %v775_v38 }
 0x230   :  { %v491_v42 = vpop.xlane.xlu1 %490  ;;  %v363_v43 = vpop.xlane.xlu0 %362 }
 0x231   :  { %v493_v44 = vsub.f32 %v485_v63, %v491_v42  ;;  %v365_v45 = vsub.f32 %v356_v0, %v363_v43 }
 0x233   :  { %v368_v46 = vmul.f32 1.442695, %v365_v45  ;;  %v496_v47 = vmul.f32 1.442695, %v493_v44 }
 0x234   :  { %v2921_v48 = vpop.permute.xlu1 %2920  ;;  %v635_v49 = vpop.xlane.xlu0 %634 }
 0x235   :  { %v2923_v50 = vunpack.i.h.bf16 %v2921_v48  ;;  %v2922_v51 = vunpack.i.l.bf16 %v2921_v48  ;;  %v637_v53 = vsub.f32 %v629_v6, %v635_v49  ;;  %2958 = vpow2.f32 %v368_v46 }
 0x236   :  { %2960 = vpow2.f32 %v496_v47 }
 0x237   :  { %v3241_v54 = vpack.c.bf16 %v2923_v50, %v2922_v51  ;;  %v640_v56 = vmul.f32 1.442695, %v637_v53 }
 0x238   :  { %v360_v57 = vpop.xlane.xlu0 %359 }
 0x239   :  { %2793 = vmatprep.subr.bf16.mxu1 %v3241_v54  ;;  %2962 = vpow2.f32 %v640_v56  ;;  %v364_v4 = vsub.f32 %v3224_v14, %v360_v57 }
 0x23b   :  { %v366_v11 = vmul.f32 1.442695, %v364_v4 }
 0x23c   :  { %v488_v58 = vpop.xlane.xlu0 %487 }
 0x23d   :  { %v492_v12 = vsub.f32 %v3229_v21, %v488_v58 }
 0x23f   :  { %v3244_v59 = vpop.eup %2958  ;;  %v494_v15 = vmul.f32 1.442695, %v492_v12 }
 0x240   :  { %v632_v60 = vpop.xlane.xlu0 %631  ;;  %v373_v61 = vsel %vm357_vm4, %v3244_v59, 0.0  ;;  %v3248_v62 = vpop.eup %2960 }
 0x241   :  { %374 = vadd.xlane.f32.xlu0 %v373_v61  ;;  %v501_v1 = vsel %vm357_vm4, %v3248_v62, 0.0  ;;  %v636_v16 = vsub.f32 %v628_v26, %v632_v60 }
 0x243   :  { %v3252_v2 = vpop.eup %2962  ;;  %v638_v14 = vmul.f32 1.442695, %v636_v16 }
 0x244   :  { %v774_v63 = vpop.xlane.xlu0 %773  ;;  %v645_v10 = vsel %vm357_vm4, %v3252_v2, 0.0 }
 0x245   :  { %v778_v0 = vsub.f32 %v770_v33, %v774_v63  ;;  %502 = vadd.xlane.f32.xlu0 %v501_v1 }
 0x247   :  { %v780_v5 = vmul.f32 1.442695, %v778_v0 }
 0x248   :  { %v777_v6 = vpop.xlane.xlu0 %776 }
 0x249   :  { %2964 = vpow2.f32 %v780_v5  ;;  %v779_v9 = vsub.f32 %v771_v37, %v777_v6  ;;  %646 = vadd.xlane.f32.xlu0 %v645_v10 }
 0x24b   :  { %v782_v13 = vmul.f32 1.442695, %v779_v9 }
 0x24d   :  { %2966 = vpow2.f32 %v782_v13 }
 0x24e   :  { %2968 = vpow2.f32 %v366_v11 }
 0x24f   :  { %2970 = vpow2.f32 %v494_v15 }
 0x250   :  { %2972 = vpow2.f32 %v638_v14 }
 0x253   :  { %v3258_v17 = vpop.eup %2964 }
 0x254   :  { %v784_v19 = vsel %vm357_vm4, %v3258_v17, 0.0 }
 0x255   :  { %785 = vadd.xlane.f32.xlu1 %v784_v19 }
 0x257   :  { %v3262_v20 = vpop.eup %2966 }
 0x258   :  { %v787_v22 = vsel %vm357_vm4, %v3262_v20, 0.0  ;;  %v2969_v21 = vpop.eup %2968 }
 0x259   :  { %788 = vadd.xlane.f32.xlu0 %v787_v22  ;;  %v370_v23 = vsel %vm357_vm4, %v2969_v21, 0.0  ;;  %v2971_v24 = vpop.eup %2970 }
 0x25a   :  { %v498_v25 = vsel %vm357_vm4, %v2971_v24, 0.0  ;;  %v2973_v26 = vpop.eup %2972 }
 0x25b   :  { %v642_v29 = vsel %vm357_vm4, %v2973_v26, 0.0 }
 0x25d   :  { %371 = vadd.xlane.f32.xlu0 %v370_v23 }
 0x261   :  { %499 = vadd.xlane.f32.xlu0 %v498_v25 }
 0x265   :  { %643 = vadd.xlane.f32.xlu0 %v642_v29 }
 0x266   :  { %2930 = vrot.lane.b32.xlu1 %v3184_v27, %s3044_s28 }
 0x27b   :  { %2925 = vrot.lane.b32.xlu0 %v3184_v27, %s3045_s29 }
 0x2ce   :  { %v375_v30 = vpop.xlane.xlu0 %374 }
 0x2cf   :  { %2974 = vrcp.f32 %v375_v30 }
 0x2d2   :  { %v503_v32 = vpop.xlane.xlu0 %502 }
 0x2d6   :  { %v647_v33 = vpop.xlane.xlu0 %646 }
 0x2d9   :  { %v2975_v44 = vpop.eup %2974 }
 0x2da   :  { %v379_v50 = vmul.f32 %v2975_v44, %v3244_v59 }
 0x2e2   :  { %v786_v37 = vpop.xlane.xlu1 %785 }
 0x2e6   :  { %v789_v34 = vpop.xlane.xlu0 %788  ;;  %v2931_v42 = vpop.permute.xlu1 %2930 }
 0x2e7   :  { %v2933_v27 = vunpack.i.h.bf16 %v2931_v42  ;;  %v2932_v46 = vunpack.i.l.bf16 %v2931_v42 }
 0x2e9   :  { %v2800_v58 = vpack.c.bf16 %v2933_v27, %v2932_v46  ;;  %v949_v46 = vld [vmem:[%s3619_s8 + $0x8] sm:$0xff] }
 0x2ea   :  { %v372_v35 = vpop.xlane.xlu0 %371 }
 0x2eb   :  { %2976 = vrcp.f32 %v372_v35 }
 0x2ec   :  { %2978 = vrcp.f32 %v503_v32 }
 0x2ed   :  { %2980 = vrcp.f32 %v786_v37 }
 0x2ee   :  { %v500_v38 = vpop.xlane.xlu0 %499 }
 0x2ef   :  { %2982 = vrcp.f32 %v500_v38 }
 0x2f0   :  { %2984 = vrcp.f32 %v647_v33 }
 0x2f1   :  { %2986 = vrcp.f32 %v789_v34 }
 0x2f2   :  { %v644_v43 = vpop.xlane.xlu0 %643 }
 0x2f3   :  { %2988 = vrcp.f32 %v644_v43 }
 0x2f5   :  { %v2977_v45 = vpop.eup %2976 }
 0x2f6   :  { %v2926_v47 = vpop.permute.xlu0 %2925  ;;  %v378_v48 = vmul.f32 %v2977_v45, %v2969_v21  ;;  %v2979_v49 = vpop.eup %2978  ;;  %v2401_v21 = vld [vmem:[%s3618_s5] ss:$0 sm:$0xff] }
 0x2f7   :  { %v2928_v51 = vunpack.i.h.bf16 %v2926_v47  ;;  %v2927_v53 = vunpack.i.l.bf16 %v2926_v47  ;;  %v2981_v56 = vpop.eup %2980  ;;  %v507_v0 = vmul.f32 %v2979_v49, %v3248_v62  ;;  %v950_v47 = vld [vmem:[%s3619_s8 + $0x10] sm:$0xff]  ;;  %v951_v49 = vld [vmem:[%s3619_s8 + $0x18] sm:$0xff] }
 0x2f8   :  { %2608 = vmatprep.mubr.msk.f32.mxu1 %vm357_vm4, %v378_v48  ;;  %v792_v59 = vmul.f32 %v2981_v56, %v3258_v17  ;;  %v1044_v56 = vld [vmem:[%s3620_s10 + $0x10] sm:$0xff] }
 0x2f9   :  { %v2983_v57 = vpop.eup %2982  ;;  %v2796_v60 = vpack.c.bf16 %v2928_v51, %v2927_v53  ;;  %2609 = vmatmul.mubr.msk.f32.vlgmr.msra.gmra.mrb[2].mxu1 %vm357_vm4, %v379_v50  ;;  %v2808_v50 = vpack.c.bf16 %v951_v49, %v950_v47  ;;  %v1042_v51 = vld [vmem:[%s3620_s10] sm:$0xff]  ;;  %v1043_v53 = vld [vmem:[%s3620_s10 + $0x8] sm:$0xff] }
 0x2fa   :  { %2795 = vmatpush3.bf16.msra.mxu1 %v3241_v54  ;;  %v506_v61 = vmul.f32 %v2983_v57, %v2971_v24  ;;  %v2985_v63 = vpop.eup %2984  ;;  %v2812_v57 = vpack.c.bf16 %v1043_v53, %v1042_v51  ;;  %v2412_v51 = vld [vmem:[%s3615_s2 + $0x20] sm:$0xff]  ;;  %v2413_v53 = vld [vmem:[%s3615_s2 + $0x28] sm:$0xff] }
 0x2fb   :  { %2801 = vmatprep.subr.bf16.mxu1 %v2800_v58  ;;  %2797 = vmatprep.subr.bf16.mxu0 %v2796_v60  ;;  %v2987_v1 = vpop.eup %2986  ;;  %v651_v54 = vmul.f32 %v2985_v63, %v3252_v2  ;;  %v1047_v63 = vld [vmem:[%s3620_s10 + $0x28] sm:$0xff] }
 0x2fc   :  { %2615 = vmatprep.mubr.msk.f32.mxu1 %vm357_vm4, %v506_v61  ;;  %2799 = vmatpush3.bf16.msra.mxu0 %v2796_v60  ;;  %v793_v6 = vmul.f32 %v2987_v1, %v3262_v20  ;;  %v1046_v61 = vld [vmem:[%s3620_s10 + $0x20] sm:$0xff] }
 0x2fd   :  { %v2989_v4 = vpop.eup %2988  ;;  %2616 = vmatmul.mubr.msk.f32.vlgmr.msra.gmra.mrb[4].mxu1 %vm357_vm4, %v507_v0  ;;  %v2820_v0 = vpack.c.bf16 %v1047_v63, %v1046_v61  ;;  %v2415_v61 = vld [vmem:[%s3615_s2 + $0x38] sm:$0xff] }
 0x2fe   :  { %2803 = vmatpush3.bf16.msra.mxu1 %v2800_v58  ;;  %2629 = vmatprep.mubr.msk.f32.mxu1 %vm357_vm4, %v792_v59  ;;  %v650_v5 = vmul.f32 %v2989_v4, %v2973_v26  ;;  %v1045_v58 = vld [vmem:[%s3620_s10 + $0x18] sm:$0xff] }
 0x2ff   :  { %v2816_v60 = vpack.c.bf16 %v1045_v58, %v1044_v56  ;;  %2813 = vmatprep.subr.bf16.mxu1 %v2812_v57  ;;  %v2424_v56 = vld [vmem:[%s3616_s4 + $0x20] sm:$0xff]  ;;  %v2425_v58 = vld [vmem:[%s3616_s4 + $0x28] sm:$0xff] }
 0x300   :  { %2622 = vmatprep.mubr.msk.f32.mxu0 %vm357_vm4, %v650_v5  ;;  %v2844_v63 = vpack.c.bf16 %v2425_v58, %v2424_v56 }
 0x301   :  { %2623 = vmatmul.mubr.msk.f32.vlgmr.msra.gmra.mrb[4].mxu0 %vm357_vm4, %v651_v54  ;;  %2630 = vmatmul.mubr.msk.f32.vlgmr.msra.gmra.mrb[6].mxu1 %vm357_vm4, %v793_v6 }
 0x302   :  { %2815 = vmatpush3.bf16.msra.mxu1 %v2812_v57  ;;  %v2828_v57 = vpack.c.bf16 %v2413_v53, %v2412_v51 }
 0x303   :  { %2817 = vmatprep.subr.bf16.mxu1 %v2816_v60 }
 0x306   :  { %2819 = vmatpush3.bf16.msra.mxu1 %v2816_v60  ;;  %v2414_v60 = vld [vmem:[%s3615_s2 + $0x30] sm:$0xff] }
 0x307   :  { %2821 = vmatprep.subr.bf16.mxu1 %v2820_v0 }
 0x30a   :  { %2823 = vmatpush3.bf16.msra.mxu1 %v2820_v0  ;;  %v2832_v0 = vpack.c.bf16 %v2415_v61, %v2414_v60 }
 0x3cc   :  { %v2610_v62 = vpop.f32.mrb[2].mxu1 }
 0x3cd   :  { %463 = vst.msk [vmem:[#allocation2 + $0x8] sm:$0xff] %vm461_vm12, %v2610_v62  ;;  %v452_v9 = vpop.f32.mrb[3].mxu1 }
 0x3ce   :  { %462 = vst.msk [vmem:[#allocation2] sm:$0xff] %vm461_vm12, %v452_v9  ;;  %v3343_v9 = vld [vmem:[%s3621_s6] ss:$0 sm:$0xff] }
 0x3d0   :  { %v2617_v10 = vpop.f32.mrb[4].mxu1 }
 0x3d1   :  { %v588_v11 = vpop.f32.mrb[5].mxu1 }
 0x3d4   :  { %v2624_v12 = vpop.f32.mrb[4].mxu0  ;;  %v2631_v13 = vpop.f32.mrb[6].mxu1 }
 0x3d5   :  { %v872_v2 = vpop.f32.mrb[7].mxu1  ;;  %743 = vrot.lane.b32.xlu0 %v2624_v12, %s3046_s30  ;;  %v730_v15 = vpop.f32.mrb[5].mxu0 }
 0x3d6   :  { %741 = vrot.lane.b32.xlu1 %v730_v15, %s3046_s30 }
 0x3d9   :  { %601 = vrot.lane.b32.xlu0 %v2617_v10, %s3047_s15 }
 0x3da   :  { %599 = vrot.lane.b32.xlu1 %v588_v11, %s3047_s15 }
 0x3dd   :  { %885 = vrot.lane.b32.xlu0 %v2631_v13, %s3048_s16  ;;  %v3348_v13 = vld [vmem:[%s3622_s7] ss:$0 sm:$0xff] }
 0x3de   :  { %883 = vrot.lane.b32.xlu1 %v872_v2, %s3048_s16 }
 0x447   :  { %v744_v16 = vpop.permute.xlu0 %743 }
 0x448   :  { %v742_v17 = vpop.permute.xlu1 %741 }
 0x44b   :  { %v602_v14 = vpop.permute.xlu0 %601 }
 0x44c   :  { %607 = vst.msk [vmem:[#allocation2 + $0x8] sm:$0xff] %vm605_vm13, %v602_v14  ;;  %v600_v19 = vpop.permute.xlu1 %599  ;;  %v1048_v14 = vld [vmem:[%s3620_s10 + $0x30] sm:$0xff] }
 0x44d   :  { %606 = vst.msk [vmem:[#allocation2] sm:$0xff] %vm605_vm13, %v600_v19  ;;  %v1049_v19 = vld [vmem:[%s3620_s10 + $0x38] sm:$0xff] }
 0x44e   :  { %749 = vst.msk [vmem:[#allocation2 + $0x8] sm:$0xff] %vm747_vm14, %v744_v16  ;;  %748 = vst.msk [vmem:[#allocation2] sm:$0xff] %vm747_vm14, %v742_v17 }
 0x44f   :  { %v886_v20 = vpop.permute.xlu0 %885 }
 0x450   :  { %891 = vst.msk [vmem:[#allocation2 + $0x8] sm:$0xff] %vm889_vm15, %v886_v20  ;;  %v884_v22 = vpop.permute.xlu1 %883  ;;  %v2824_v20 = vpack.c.bf16 %v1049_v19, %v1048_v14 }
 0x451   :  { %890 = vst.msk [vmem:[#allocation2] sm:$0xff] %vm889_vm15, %v884_v22  ;;  %v2404_v22 = vld [vmem:[%s3623_s9] ss:$0 sm:$0xff] }
 0x452   :  { %2825 = vmatprep.subr.bf16.mxu1 %v2824_v20 }
 0x453   :  { %2827 = vmatpush3.bf16.msra.mxu1 %v2824_v20 }
 0x454   :  { %2845 = vmatprep.subr.bf16.mxu1 %v2844_v63 }
 0x457   :  { %v893_v23 = vld [vmem:[#allocation2 + $0x8] sm:$0xff] }
 0x458   :  { %v902_v24 = vadd.f32 %v2401_v21, %v893_v23  ;;  %v892_v25 = vld [vmem:[#allocation2] sm:$0xff] }
 0x459   :  { %v901_v26 = vadd.f32 %v2401_v21, %v892_v25 }
 0x45a   :  { %v904_v29 = vadd.f32 %v902_v24, %v3168_v18 }
 0x45b   :  { %v903_v30 = vadd.f32 %v901_v26, %v3141_v7  ;;  %v948_v7 = vld [vmem:[%s3619_s8] sm:$0xff] }
 0x45c   :  { %v908_v32 = vsel %vm61_vm0, %v904_v29, 0.0  ;;  %v2804_v48 = vpack.c.bf16 %v949_v46, %v948_v7 }
 0x45d   :  { %909 = vadd.xlane.f32.xlu0 %v908_v32  ;;  %v905_v33 = vsel %vm61_vm0, %v903_v30, 0.0 }
 0x45e   :  { %906 = vadd.xlane.f32.xlu1 %v905_v33  ;;  %2805 = vmatprep.subr.bf16.mxu0 %v2804_v48 }
 0x45f   :  { %2807 = vmatpush3.bf16.msra.mxu0 %v2804_v48 }
 0x460   :  { %2809 = vmatprep.subr.bf16.mxu0 %v2808_v50 }
 0x463   :  { %2811 = vmatpush3.bf16.msra.mxu0 %v2808_v50 }
 0x464   :  { %2829 = vmatprep.subr.bf16.mxu0 %v2828_v57 }
 0x4ea   :  { %v910_v34 = vpop.xlane.xlu0 %909 }
 0x4eb   :  { %v913_v35 = vmul.f32 0.03125, %v910_v34  ;;  %v907_v37 = vpop.xlane.xlu1 %906 }
 0x4ec   :  { %v912_v38 = vmul.f32 0.03125, %v907_v37 }
 0x4ed   :  { %v915_v42 = vsub.f32 %v904_v29, %v913_v35 }
 0x4ee   :  { %v914_v43 = vsub.f32 %v903_v30, %v912_v38  ;;  %v2407_v30 = vld [vmem:[%s3624_s11] ss:$0 sm:$0xff] }
 0x4ef   :  { %v917_v44 = vmul.f32 %v915_v42, %v915_v42 }
 0x4f0   :  { %v916_v45 = vmul.f32 %v914_v43, %v914_v43 }
 0x4f1   :  { %v921_v27 = vsel %vm61_vm0, %v917_v44, 0.0 }
 0x4f2   :  { %922 = vadd.xlane.f32.xlu1 %v921_v27  ;;  %v918_v18 = vsel %vm61_vm0, %v916_v45, 0.0 }
 0x4f3   :  { %919 = vadd.xlane.f32.xlu0 %v918_v18 }
 0x57f   :  { %v923_v1 = vpop.xlane.xlu1 %922 }
 0x580   :  { %v925_v59 = vmul.f32 0.03125, %v923_v1  ;;  %v920_v4 = vpop.xlane.xlu0 %919  ;;  %v2426_v1 = vld [vmem:[%s3616_s4 + $0x30] sm:$0xff] }
 0x581   :  { %v924_v5 = vmul.f32 0.03125, %v920_v4 }
 0x582   :  { %v927_v54 = vadd.f32 1e-05, %v925_v59  ;;  %v2427_v59 = vld [vmem:[%s3616_s4 + $0x38] sm:$0xff] }
 0x583   :  { %v926_v6 = vadd.f32 1e-05, %v924_v5  ;;  %v2848_v4 = vpack.c.bf16 %v2427_v59, %v2426_v1  ;;  %v2418_v5 = vld [vmem:[%s3613_s3 + $0x20] sm:$0xff] }
 0x584   :  { %2990 = vrsqrt.f32 %v927_v54  ;;  %v2419_v54 = vld [vmem:[%s3613_s3 + $0x28] sm:$0xff] }
 0x585   :  { %2992 = vrsqrt.f32 %v926_v6  ;;  %v2836_v6 = vpack.c.bf16 %v2419_v54, %v2418_v5 }
 0x58e   :  { %v2991_v62 = vpop.eup %2990 }
 0x58f   :  { %v2993_v10 = vpop.eup %2992  ;;  %v931_v11 = vmul.f32 %v2991_v62, %v915_v42 }
 0x590   :  { %v930_v12 = vmul.f32 %v2993_v10, %v914_v43 }
 0x591   :  { %v939_v2 = vmul.f32 %v3343_v9, %v931_v11 }
 0x592   :  { %v938_v15 = vmul.f32 %v3343_v9, %v930_v12 }
 0x593   :  { %v947_v17 = vadd.f32 %v3348_v13, %v939_v2 }
 0x594   :  { %v946_v16 = vadd.f32 %v3348_v13, %v938_v15 }
 0x596   :  { %2640 = vmatprep.mubr.msk.f32.mxu0 %vm61_vm0, %v946_v16 }
 0x597   :  { %2641 = vmatmul.mubr.msk.f32.vlgmr.msra.gmra.mrb[6].mxu0 %vm61_vm0, %v947_v17 }
 0x598   :  { %2831 = vmatpush3.bf16.msra.mxu0 %v2828_v57 }
 0x599   :  { %2833 = vmatprep.subr.bf16.mxu0 %v2832_v0 }
 0x59c   :  { %2835 = vmatpush3.bf16.msra.mxu0 %v2832_v0 }
 0x59d   :  { %2837 = vmatprep.subr.bf16.mxu0 %v2836_v6 }
 0x66a   :  { %v2642_v21 = vpop.f32.mrb[6].mxu0 }
 0x66b   :  { %v1037_v23 = vadd.f32 %v2642_v21, %v2404_v22  ;;  %v1031_v24 = vpop.f32.mrb[7].mxu0  ;;  %v2420_v21 = vld [vmem:[%s3613_s3 + $0x30] sm:$0xff] }
 0x66c   :  { %v1032_v25 = vadd.f32 %v2404_v22, %v1031_v24 }
 0x66d   :  { %v1041_v29 = vmax.f32 %v1037_v23, 0.0  ;;  %v2421_v23 = vld [vmem:[%s3613_s3 + $0x38] sm:$0xff] }
 0x66e   :  { %v1040_v26 = vmax.f32 %v1032_v25, 0.0 }
 0x670   :  { %2659 = vmatprep.mubr.msk.f32.mxu1 %vm1057_vm1, %v1040_v26  ;;  %v2840_v26 = vpack.c.bf16 %v2421_v23, %v2420_v21 }
 0x671   :  { %2660 = vmatmul.mubr.msk.f32.vlgmr.msra.gmra.mrb[8].mxu1 %vm1057_vm1, %v1041_v29 }
 0x672   :  { %2847 = vmatpush3.bf16.msra.mxu1 %v2844_v63 }
 0x673   :  { %2849 = vmatprep.subr.bf16.mxu1 %v2848_v4 }
 0x676   :  { %2851 = vmatpush3.bf16.msra.mxu1 %v2848_v4 }
 0x744   :  { %v2661_v32 = vpop.f32.mrb[8].mxu1 }
 0x745   :  { %v1136_v33 = vadd.f32 %v2661_v32, %v2407_v30  ;;  %v1130_v34 = vpop.f32.mrb[9].mxu1 }
 0x746   :  { %v1131_v35 = vadd.f32 %v2407_v30, %v1130_v34 }
 0x747   :  { %v1140_v37 = vadd.f32 %v1136_v33, %v947_v17 }
 0x748   :  { %v1139_v38 = vadd.f32 %v1131_v35, %v946_v16 }
 0x749   :  { %v1144_v42 = vsel %vm61_vm0, %v1140_v37, 0.0 }
 0x74a   :  { %1145 = vadd.xlane.f32.xlu1 %v1144_v42  ;;  %v1141_v43 = vsel %vm61_vm0, %v1139_v38, 0.0 }
 0x74b   :  { %1142 = vadd.xlane.f32.xlu0 %v1141_v43 }
 0x7d7   :  { %v1146_v44 = vpop.xlane.xlu1 %1145 }
 0x7d8   :  { %v1148_v45 = vmul.f32 0.03125, %v1146_v44  ;;  %v1143_v27 = vpop.xlane.xlu0 %1142 }
 0x7d9   :  { %v1147_v18 = vmul.f32 0.03125, %v1143_v27 }
 0x7da   :  { %v1150_v7 = vsub.f32 %v1140_v37, %v1148_v45 }
 0x7db   :  { %v1149_v46 = vsub.f32 %v1139_v38, %v1147_v18 }
 0x7dc   :  { %v1152_v47 = vmul.f32 %v1150_v7, %v1150_v7 }
 0x7dd   :  { %v1151_v48 = vmul.f32 %v1149_v46, %v1149_v46 }
 0x7de   :  { %v1156_v49 = vsel %vm61_vm0, %v1152_v47, 0.0 }
 0x7df   :  { %1157 = vadd.xlane.f32.xlu1 %v1156_v49  ;;  %v1153_v50 = vsel %vm61_vm0, %v1151_v48, 0.0 }
 0x7e0   :  { %1154 = vadd.xlane.f32.xlu0 %v1153_v50 }
 0x86c   :  { %v1158_v62 = vpop.xlane.xlu1 %1157 }
 0x86d   :  { %v1160_v10 = vmul.f32 0.03125, %v1158_v62  ;;  %v1155_v11 = vpop.xlane.xlu0 %1154 }
 0x86e   :  { %v1159_v12 = vmul.f32 0.03125, %v1155_v11 }
 0x86f   :  { %v1162_v2 = vadd.f32 1e-05, %v1160_v10 }
 0x870   :  { %v1161_v15 = vadd.f32 1e-05, %v1159_v12 }
 0x871   :  { %2994 = vrsqrt.f32 %v1162_v2 }
 0x872   :  { %2996 = vrsqrt.f32 %v1161_v15 }
 0x87b   :  { %v2995_v16 = vpop.eup %2994 }
 0x87c   :  { %v2997_v17 = vpop.eup %2996  ;;  %v1166_v14 = vmul.f32 %v2995_v16, %v1150_v7 }
 0x87d   :  { %v1165_v19 = vmul.f32 %v2997_v17, %v1149_v46 }
 0x87e   :  { %v1168_v20 = vmul.f32 %v3343_v9, %v1166_v14 }
 0x87f   :  { %v1167_v22 = vmul.f32 %v3343_v9, %v1165_v19 }
 0x880   :  { %v3416_v25 = vadd.f32 %v3348_v13, %v1168_v20 }
 0x881   :  { %v3413_v24 = vadd.f32 %v3348_v13, %v1167_v22 }
 0x883   :  { %2670 = vmatprep.mubr.msk.f32.mxu0 %vm61_vm0, %v3413_v24  ;;  %2692 = vmatprep.mubr.msk.f32.mxu1 %vm61_vm0, %v3413_v24 }
 0x884   :  { %2671 = vmatmul.mubr.msk.f32.vlgmr.msra.gmra.mrb[8].mxu0 %vm61_vm0, %v3416_v25  ;;  %2693 = vmatmul.mubr.msk.f32.vlgmr.msra.gmra.mrb[10].mxu1 %vm61_vm0, %v3416_v25 }
 0x885   :  { %2839 = vmatpush3.bf16.msra.mxu0 %v2836_v6  ;;  %2681 = vmatprep.mubr.msk.f32.mxu0 %vm61_vm0, %v3413_v24 }
 0x886   :  { %2841 = vmatprep.subr.bf16.mxu0 %v2840_v26 }
 0x889   :  { %2843 = vmatpush3.bf16.msra.mxu0 %v2840_v26 }
 0x88c   :  { %2682 = vmatmul.mubr.msk.f32.vlgmr.msra.gmra.mrb[10].mxu0 %vm61_vm0, %v3416_v25 }
 0x957   :  { %v2672_v9 = vpop.f32.mrb[8].mxu0  ;;  %v2694_v13 = vpop.f32.mrb[10].mxu1 }
 0x958   :  { %v1252_v29 = vpop.f32.mrb[9].mxu0  ;;  %v1412_v30 = vpop.f32.mrb[11].mxu1 }
 0x959   :  { %v2852_v32 = vpack.c.bf16 %v2672_v9, %v1252_v29  ;;  %v3430_v33 = vpack.i.bf16 %v2672_v9, %v1252_v29 }
 0x95b   :  { %2853 = vmatprep.subr.bf16.mxu0 %v2852_v32 }
 0x95c   :  { %2855 = vmatpush3.bf16.msra.mxu0 %v2852_v32 }
 0x95f   :  { %v2683_v34 = vpop.f32.mrb[10].mxu0 }
 0x960   :  { %1460 = vperm.xlu1 %2935, %v2683_v34   ;;  %v1332_v35 = vpop.f32.mrb[11].mxu0 }
 0x961   :  { %1455 = vperm.xlu0 %2934, %v1332_v35  }
 0x964   :  { %2936 = vset.pattern.permute.xlu1 %v3038_v3 }
 0x965   :  { %1587 = vperm.xlu1 %2936, %v2683_v34   ;;  %2957 = vset.pattern.permute.xlu0 %v3041_v31 }
 0x969   :  { %2937 = vset.pattern.permute.xlu1 %v3040_v28 }
 0x96a   :  { %1730 = vperm.xlu1 %2937, %v2683_v34  }
 0x96e   :  { %2938 = vset.pattern.permute.xlu1 %v3041_v31 }
 0x96f   :  { %1871 = vperm.xlu1 %2938, %v2683_v34  }
 0x973   :  { %2939 = vset.pattern.permute.xlu1 %v3038_v3 }
 0x974   :  { %1583 = vperm.xlu1 %2939, %v1332_v35  }
 0x978   :  { %2940 = vset.pattern.permute.xlu1 %v3040_v28 }
 0x979   :  { %1726 = vperm.xlu1 %2940, %v1332_v35  }
 0x97d   :  { %2941 = vset.pattern.permute.xlu1 %v3041_v31 }
 0x97e   :  { %1867 = vperm.xlu1 %2941, %v1332_v35  }
 0x9a7   :  { %1421 = vxpose.xlu1.b32.start [1/2] (short) (narrow) %v1412_v30, 8 }
 0x9ab   :  { %1422 = vxpose.xlu1.b32.end [2/2] (short) (narrow) %v2694_v13, 8 }
 0x9df   :  { %v1461_v37 = vpop.permute.xlu1 %1460 }
 0x9e0   :  { %v1456_v7 = vpop.permute.xlu0 %1455 }
 0x9e4   :  { %v1588_v38 = vpop.permute.xlu1 %1587 }
 0x9e9   :  { %v1731_v42 = vpop.permute.xlu1 %1730 }
 0x9ee   :  { %v1872_v43 = vpop.permute.xlu1 %1871 }
 0x9f3   :  { %v1584_v44 = vpop.permute.xlu1 %1583 }
 0x9f8   :  { %v1727_v45 = vpop.permute.xlu1 %1726 }
 0x9fd   :  { %v1868_v27 = vpop.permute.xlu1 %1867 }
 0xa27   :  { %v1437_v18 = vpop.trf.xlu1 }
 0xa28   :  { %v1466_v3 = vrot.slane %v1437_v18, %v345_v39  ;;  %v1593_v28 = vrot.slane %v1437_v18, %v474_v40  ;;  %v1736_v31 = vrot.slane %v1437_v18, %v618_v41  ;;  %v1877_v61 = vrot.slane %v1437_v18, %v760_v52 }
 0xa2a   :  { %v1467_v46 = vadd.f32 %v1466_v3, %v1456_v7  ;;  %v1468_v47 = vadd.f32 %v1466_v3, %v1461_v37  ;;  %v1595_v48 = vadd.f32 %v1593_v28, %v1588_v38  ;;  %v1738_v49 = vadd.f32 %v1736_v31, %v1731_v42 }
 0xa2b   :  { %v1594_v56 = vadd.f32 %v1593_v28, %v1584_v44  ;;  %v1737_v1 = vadd.f32 %v1736_v31, %v1727_v45  ;;  %v1878_v62 = vadd.f32 %v1877_v61, %v1868_v27  ;;  %v1879_v12 = vadd.f32 %v1877_v61, %v1872_v43 }
 0xa2c   :  { %vm1470_vm2 = vcmp.gt.f32.partialorder %v1468_v47, 0.0  ;;  %v1472_v50 = vmul.f32 0.2, %v1468_v47  ;;  %vm1597_vm3 = vcmp.gt.f32.partialorder %v1595_v48, 0.0  ;;  %v1599_v51 = vmul.f32 0.2, %v1595_v48 }
 0xa2d   :  { %vm1740_vm5 = vcmp.gt.f32.partialorder %v1738_v49, 0.0  ;;  %v1742_v53 = vmul.f32 0.2, %v1738_v49  ;;  %v1471_v58 = vmul.f32 0.2, %v1467_v46  ;;  %vm1469_vm6 = vcmp.gt.f32.partialorder %v1467_v46, 0.0 }
 0xa2e   :  { %v1474_v57 = vsel %vm1470_vm2, %v1468_v47, %v1472_v50  ;;  %v1601_v39 = vsel %vm1597_vm3, %v1595_v48, %v1599_v51  ;;  %v1598_v5 = vmul.f32 0.2, %v1594_v56  ;;  %vm1596_vm7 = vcmp.gt.f32.partialorder %v1594_v56, 0.0 }
 0xa2f   :  { %v1744_v60 = vsel %vm1740_vm5, %v1738_v49, %v1742_v53  ;;  %v1476_v40 = vadd.f32 %v1474_v57, %v3211_v55  ;;  %v1603_v0 = vadd.f32 %v1601_v39, %v3211_v55  ;;  %v1473_v4 = vsel %vm1469_vm6, %v1467_v46, %v1471_v58 }
 0xa30   :  { %v1746_v41 = vadd.f32 %v1744_v60, %v3211_v55  ;;  %v1475_v6 = vadd.f32 %v1473_v4, %v3218_v8  ;;  %v1600_v36 = vsel %vm1596_vm7, %v1594_v56, %v1598_v5  ;;  %v1741_v52 = vmul.f32 0.2, %v1737_v1 }
 0xa31   :  { %v1480_v63 = vsel %vm357_vm4, %v1476_v40, -inf  ;;  %v1607_v54 = vsel %vm357_vm4, %v1603_v0, -inf  ;;  %vm1739_vm8 = vcmp.gt.f32.partialorder %v1737_v1, 0.0  ;;  %v1602_v11 = vadd.f32 %v1600_v36, %v3218_v8 }
 0xa32   :  { %v1750_v59 = vsel %vm357_vm4, %v1746_v41, -inf  ;;  %1481 = vmax.xlane.f32.xlu0 %v1480_v63  ;;  %v1477_v10 = vsel %vm357_vm4, %v1475_v6, -inf  ;;  %v1743_v2 = vsel %vm1739_vm8, %v1737_v1, %v1741_v52  ;;  %v1882_v15 = vmul.f32 0.2, %v1878_v62 }
 0xa33   :  { %1751 = vmax.xlane.f32.xlu1 %v1750_v59  ;;  %vm1880_vm9 = vcmp.gt.f32.partialorder %v1878_v62, 0.0  ;;  %v1604_v16 = vsel %vm357_vm4, %v1602_v11, -inf  ;;  %v1745_v17 = vadd.f32 %v1743_v2, %v3218_v8  ;;  %v1883_v19 = vmul.f32 0.2, %v1879_v12 }
 0xa34   :  { %v1884_v14 = vsel %vm1880_vm9, %v1878_v62, %v1882_v15  ;;  %vm1881_vm10 = vcmp.gt.f32.partialorder %v1879_v12, 0.0 }
 0xa35   :  { %v1747_v20 = vsel %vm357_vm4, %v1745_v17, -inf  ;;  %v1886_v22 = vadd.f32 %v1884_v14, %v3218_v8  ;;  %v1885_v21 = vsel %vm1881_vm10, %v1879_v12, %v1883_v19 }
 0xa36   :  { %1608 = vmax.xlane.f32.xlu0 %v1607_v54  ;;  %v1887_v26 = vadd.f32 %v1885_v21, %v3211_v55 }
 0xa37   :  { %v1888_v23 = vsel %vm357_vm4, %v1886_v22, -inf }
 0xa38   :  { %v1891_v9 = vsel %vm357_vm4, %v1887_v26, -inf }
 0xa3a   :  { %1478 = vmax.xlane.f32.xlu0 %v1477_v10 }
 0xa3e   :  { %1605 = vmax.xlane.f32.xlu0 %v1604_v16 }
 0xa42   :  { %1748 = vmax.xlane.f32.xlu0 %v1747_v20 }
 0xa46   :  { %1889 = vmax.xlane.f32.xlu0 %v1888_v23 }
 0xa4a   :  { %1892 = vmax.xlane.f32.xlu0 %v1891_v9 }
 0xabf   :  { %v1482_v13 = vpop.xlane.xlu0 %1481 }
 0xac0   :  { %v1752_v29 = vpop.xlane.xlu1 %1751  ;;  %v1484_v30 = vsub.f32 %v1476_v40, %v1482_v13 }
 0xac1   :  { %v1754_v32 = vsub.f32 %v1746_v41, %v1752_v29 }
 0xac2   :  { %v1487_v34 = vmul.f32 1.442695, %v1484_v30 }
 0xac3   :  { %v1609_v35 = vpop.xlane.xlu0 %1608  ;;  %v1757_v38 = vmul.f32 1.442695, %v1754_v32 }
 0xac4   :  { %2998 = vpow2.f32 %v1487_v34  ;;  %v1611_v37 = vsub.f32 %v1603_v0, %v1609_v35 }
 0xac6   :  { %v1614_v8 = vmul.f32 1.442695, %v1611_v37 }
 0xac7   :  { %v1479_v42 = vpop.xlane.xlu0 %1478 }
 0xac8   :  { %3000 = vpow2.f32 %v1614_v8  ;;  %v1483_v43 = vsub.f32 %v1475_v6, %v1479_v42 }
 0xac9   :  { %3002 = vpow2.f32 %v1757_v38 }
 0xaca   :  { %v1485_v44 = vmul.f32 1.442695, %v1483_v43 }
 0xacb   :  { %v1606_v55 = vpop.xlane.xlu0 %1605 }
 0xacc   :  { %v1610_v45 = vsub.f32 %v1602_v11, %v1606_v55  ;;  %3004 = vpow2.f32 %v1485_v44 }
 0xace   :  { %v2999_v27 = vpop.eup %2998  ;;  %v1612_v18 = vmul.f32 1.442695, %v1610_v45 }
 0xacf   :  { %v1749_v3 = vpop.xlane.xlu0 %1748  ;;  %v1492_v28 = vsel %vm357_vm4, %v2999_v27, 0.0 }
 0xad0   :  { %v1753_v31 = vsub.f32 %v1745_v17, %v1749_v3  ;;  %1493 = vadd.xlane.f32.xlu0 %v1492_v28  ;;  %3006 = vpow2.f32 %v1612_v18 }
 0xad2   :  { %v3464_v7 = vpop.eup %3000  ;;  %v1755_v46 = vmul.f32 1.442695, %v1753_v31 }
 0xad3   :  { %v1890_v47 = vpop.xlane.xlu0 %1889  ;;  %v1619_v48 = vsel %vm357_vm4, %v3464_v7, 0.0  ;;  %v3468_v49 = vpop.eup %3002 }
 0xad4   :  { %v1894_v50 = vsub.f32 %v1886_v22, %v1890_v47  ;;  %1620 = vadd.xlane.f32.xlu0 %v1619_v48  ;;  %3008 = vpow2.f32 %v1755_v46  ;;  %v1762_v56 = vsel %vm357_vm4, %v3468_v49, 0.0 }
 0xad6   :  { %v1896_v51 = vmul.f32 1.442695, %v1894_v50  ;;  %v3005_v57 = vpop.eup %3004 }
 0xad7   :  { %v1893_v53 = vpop.xlane.xlu0 %1892  ;;  %v1489_v60 = vsel %vm357_vm4, %v3005_v57, 0.0 }
 0xad8   :  { %v1895_v39 = vsub.f32 %v1887_v26, %v1893_v53  ;;  %1763 = vadd.xlane.f32.xlu0 %v1762_v56  ;;  %3010 = vpow2.f32 %v1896_v51 }
 0xada   :  { %v1898_v58 = vmul.f32 1.442695, %v1895_v39  ;;  %v3007_v40 = vpop.eup %3006 }
 0xadb   :  { %v1616_v41 = vsel %vm357_vm4, %v3007_v40, 0.0 }
 0xadc   :  { %3012 = vpow2.f32 %v1898_v58  ;;  %1490 = vadd.xlane.f32.xlu0 %v1489_v60 }
 0xade   :  { %v3009_v61 = vpop.eup %3008 }
 0xadf   :  { %v1759_v63 = vsel %vm357_vm4, %v3009_v61, 0.0 }
 0xae0   :  { %1617 = vadd.xlane.f32.xlu0 %v1616_v41 }
 0xae2   :  { %v3011_v0 = vpop.eup %3010 }
 0xae3   :  { %v1900_v59 = vsel %vm357_vm4, %v3011_v0, 0.0 }
 0xae4   :  { %1760 = vadd.xlane.f32.xlu0 %v1759_v63 }
 0xae6   :  { %v3475_v1 = vpop.eup %3012 }
 0xae7   :  { %v1903_v4 = vsel %vm357_vm4, %v3475_v1, 0.0 }
 0xae8   :  { %1901 = vadd.xlane.f32.xlu0 %v1900_v59  ;;  %1904 = vadd.xlane.f32.xlu1 %v1903_v4 }
 0xaf9   :  { %2948 = vrot.lane.b32.xlu1 %v3430_v33, %s3045_s29 }
 0xafd   :  { %2953 = vrot.lane.b32.xlu1 %v3430_v33, %s3044_s28 }
 0xafe   :  { %2943 = vrot.lane.b32.xlu0 %v3430_v33, %s3043_s1 }
 0xb5d   :  { %v1494_v5 = vpop.xlane.xlu0 %1493 }
 0xb5e   :  { %3014 = vrcp.f32 %v1494_v5 }
 0xb61   :  { %v1621_v54 = vpop.xlane.xlu0 %1620 }
 0xb65   :  { %v1764_v6 = vpop.xlane.xlu0 %1763 }
 0xb68   :  { %v3015_v10 = vpop.eup %3014 }
 0xb69   :  { %v1491_v62 = vpop.xlane.xlu0 %1490  ;;  %v1498_v16 = vmul.f32 %v3015_v10, %v2999_v27  ;;  %v2443_v10 = vld [vmem:[%s3619_s8 + $0x28] sm:$0xff] }
 0xb6a   :  { %3016 = vrcp.f32 %v1491_v62 }
 0xb6d   :  { %v1618_v36 = vpop.xlane.xlu0 %1617 }
 0xb6e   :  { %3018 = vrcp.f32 %v1618_v36 }
 0xb6f   :  { %3020 = vrcp.f32 %v1621_v54 }
 0xb71   :  { %v1761_v52 = vpop.xlane.xlu0 %1760 }
 0xb72   :  { %3022 = vrcp.f32 %v1761_v52 }
 0xb73   :  { %3024 = vrcp.f32 %v1764_v6 }
 0xb74   :  { %v3017_v11 = vpop.eup %3016 }
 0xb75   :  { %v1905_v12 = vpop.xlane.xlu1 %1904  ;;  %v1902_v2 = vpop.xlane.xlu0 %1901  ;;  %v1497_v15 = vmul.f32 %v3017_v11, %v3005_v57  ;;  %v2439_v57 = vld [vmem:[%s3618_s5 + $0x1] ss:$0 sm:$0xff]  ;;  %v2444_v11 = vld [vmem:[%s3619_s8 + $0x30] sm:$0xff] }
 0xb76   :  { %3026 = vrcp.f32 %v1902_v2  ;;  %v2445_v2 = vld [vmem:[%s3619_s8 + $0x38] sm:$0xff] }
 0xb77   :  { %2699 = vmatprep.mubr.msk.f32.mxu0 %vm357_vm4, %v1497_v15  ;;  %3028 = vrcp.f32 %v1905_v12  ;;  %v2872_v15 = vpack.c.bf16 %v2445_v2, %v2444_v11 }
 0xb78   :  { %v3019_v33 = vpop.eup %3018  ;;  %2700 = vmatmul.mubr.msk.f32.vlgmr.msra.gmra.mrb[12].mxu0 %vm357_vm4, %v1498_v16  ;;  %v2450_v16 = vld [vmem:[%s3620_s10 + $0x40] sm:$0xff] }
 0xb79   :  { %v2949_v17 = vpop.permute.xlu1 %2948  ;;  %v2944_v14 = vpop.permute.xlu0 %2943  ;;  %v1624_v19 = vmul.f32 %v3019_v33, %v3007_v40  ;;  %v2451_v33 = vld [vmem:[%s3620_s10 + $0x48] sm:$0xff] }
 0xb7a   :  { %v2951_v20 = vunpack.i.h.bf16 %v2949_v17  ;;  %v2950_v22 = vunpack.i.l.bf16 %v2949_v17  ;;  %v2946_v21 = vunpack.i.h.bf16 %v2944_v14  ;;  %v2945_v23 = vunpack.i.l.bf16 %v2944_v14  ;;  %v3021_v26 = vpop.eup %3020  ;;  %v2452_v17 = vld [vmem:[%s3620_s10 + $0x50] sm:$0xff] }
 0xb7b   :  { %2706 = vmatprep.mubr.msk.f32.mxu1 %vm357_vm4, %v1624_v19  ;;  %v1625_v38 = vmul.f32 %v3021_v26, %v3464_v7  ;;  %v2876_v14 = vpack.c.bf16 %v2451_v33, %v2450_v16  ;;  %v2453_v19 = vld [vmem:[%s3620_s10 + $0x58] sm:$0xff] }
 0xb7c   :  { %v3023_v9 = vpop.eup %3022  ;;  %v2860_v13 = vpack.c.bf16 %v2951_v20, %v2950_v22  ;;  %v2856_v29 = vpack.c.bf16 %v2946_v21, %v2945_v23  ;;  %v2880_v20 = vpack.c.bf16 %v2453_v19, %v2452_v17  ;;  %v2454_v22 = vld [vmem:[%s3620_s10 + $0x60] sm:$0xff]  ;;  %v2455_v21 = vld [vmem:[%s3620_s10 + $0x68] sm:$0xff] }
 0xb7d   :  { %v3025_v30 = vpop.eup %3024  ;;  %v2954_v32 = vpop.permute.xlu1 %2953  ;;  %v1767_v34 = vmul.f32 %v3023_v9, %v3009_v61  ;;  %v2884_v23 = vpack.c.bf16 %v2455_v21, %v2454_v22 }
 0xb7e   :  { %v2956_v35 = vunpack.i.h.bf16 %v2954_v32  ;;  %v2955_v37 = vunpack.i.l.bf16 %v2954_v32  ;;  %2857 = vmatprep.subr.bf16.mxu1 %v2856_v29  ;;  %2861 = vmatprep.subr.bf16.mxu0 %v2860_v13  ;;  %v1768_v8 = vmul.f32 %v3025_v30, %v3468_v49 }
 0xb7f   :  { %2859 = vmatpush3.bf16.msra.mxu1 %v2856_v29  ;;  %2863 = vmatpush3.bf16.msra.mxu0 %v2860_v13 }
 0xb80   :  { %v2864_v42 = vpack.c.bf16 %v2956_v35, %v2955_v37  ;;  %2713 = vmatprep.mubr.msk.f32.mxu0 %vm357_vm4, %v1767_v34  ;;  %v3027_v43 = vpop.eup %3026  ;;  %v3553_v35 = vld [vmem:[%s3621_s6 + $0x1] ss:$0 sm:$0xff] }
 0xb81   :  { %v3029_v44 = vpop.eup %3028  ;;  %v1908_v55 = vmul.f32 %v3027_v43, %v3011_v0 }
 0xb82   :  { %2707 = vmatmul.mubr.msk.f32.vlgmr.msra.gmra.mrb[12].mxu1 %vm357_vm4, %v1625_v38  ;;  %2714 = vmatmul.mubr.msk.f32.vlgmr.msra.gmra.mrb[14].mxu0 %vm357_vm4, %v1768_v8  ;;  %v1909_v45 = vmul.f32 %v3029_v44, %v3475_v1  ;;  %v3558_v38 = vld [vmem:[%s3622_s7 + $0x1] ss:$0 sm:$0xff] }
 0xb83   :  { %2865 = vmatprep.subr.bf16.mxu1 %v2864_v42  ;;  %2720 = vmatprep.mubr.msk.f32.mxu1 %vm357_vm4, %v1908_v55 }
 0xb84   :  { %2867 = vmatpush3.bf16.msra.mxu1 %v2864_v42 }
 0xb85   :  { %2877 = vmatprep.subr.bf16.mxu1 %v2876_v14 }
 0xb87   :  { %2721 = vmatmul.mubr.msk.f32.vlgmr.msra.gmra.mrb[14].mxu1 %vm357_vm4, %v1909_v45 }
 0xb88   :  { %2879 = vmatpush3.bf16.msra.mxu1 %v2876_v14 }
 0xb89   :  { %2881 = vmatprep.subr.bf16.mxu1 %v2880_v20 }
 0xb8c   :  { %2883 = vmatpush3.bf16.msra.mxu1 %v2880_v20 }
 0xb8d   :  { %2885 = vmatprep.subr.bf16.mxu1 %v2884_v23 }
 0xb90   :  { %2887 = vmatpush3.bf16.msra.mxu1 %v2884_v23 }
 0xc4b   :  { %v2701_v27 = vpop.f32.mrb[12].mxu0 }
 0xc4c   :  { %1581 = vst.msk [vmem:[#allocation2 + $0x8] sm:$0xff] %vm461_vm12, %v2701_v27  ;;  %v1571_v18 = vpop.f32.mrb[13].mxu0  ;;  %v2456_v27 = vld [vmem:[%s3620_s10 + $0x70] sm:$0xff] }
 0xc4d   :  { %1580 = vst.msk [vmem:[#allocation2] sm:$0xff] %vm461_vm12, %v1571_v18  ;;  %v2457_v18 = vld [vmem:[%s3620_s10 + $0x78] sm:$0xff] }
 0xc55   :  { %v2708_v3 = vpop.f32.mrb[12].mxu1  ;;  %v2715_v28 = vpop.f32.mrb[14].mxu0 }
 0xc56   :  { %v1847_v31 = vpop.f32.mrb[15].mxu0  ;;  %1719 = vrot.lane.b32.xlu1 %v2708_v3, %s3047_s15  ;;  %v1706_v7 = vpop.f32.mrb[13].mxu1  ;;  %v2888_v3 = vpack.c.bf16 %v2457_v18, %v2456_v27 }
 0xc57   :  { %1717 = vrot.lane.b32.xlu0 %v1706_v7, %s3047_s15 }
 0xc58   :  { %2889 = vmatprep.subr.bf16.mxu1 %v2888_v3 }
 0xc59   :  { %2891 = vmatpush3.bf16.msra.mxu1 %v2888_v3 }
 0xc5a   :  { %v2722_v46 = vpop.f32.mrb[14].mxu1  ;;  %1860 = vrot.lane.b32.xlu1 %v2715_v28, %s3046_s30  ;;  %v2447_v28 = vld [vmem:[%s3623_s9 + $0x1] ss:$0 sm:$0xff] }
 0xc5b   :  { %v1988_v47 = vpop.f32.mrb[15].mxu1  ;;  %1858 = vrot.lane.b32.xlu0 %v1847_v31, %s3046_s30 }
 0xc5e   :  { %2001 = vrot.lane.b32.xlu1 %v2722_v46, %s3048_s16 }
 0xc5f   :  { %1999 = vrot.lane.b32.xlu0 %v1988_v47, %s3048_s16 }
 0xcc8   :  { %v1720_v48 = vpop.permute.xlu1 %1719 }
 0xcc9   :  { %1724 = vst.msk [vmem:[#allocation2 + $0x8] sm:$0xff] %vm605_vm13, %v1720_v48  ;;  %v1718_v49 = vpop.permute.xlu0 %1717 }
 0xcca   :  { %1723 = vst.msk [vmem:[#allocation2] sm:$0xff] %vm605_vm13, %v1718_v49 }
 0xccc   :  { %v1861_v50 = vpop.permute.xlu1 %1860 }
 0xccd   :  { %1865 = vst.msk [vmem:[#allocation2 + $0x8] sm:$0xff] %vm747_vm14, %v1861_v50  ;;  %v1859_v51 = vpop.permute.xlu0 %1858  ;;  %v2459_v50 = vld [vmem:[%s3624_s11 + $0x1] ss:$0 sm:$0xff] }
 0xcce   :  { %1864 = vst.msk [vmem:[#allocation2] sm:$0xff] %vm747_vm14, %v1859_v51 }
 0xcd0   :  { %v2002_v53 = vpop.permute.xlu1 %2001 }
 0xcd1   :  { %2006 = vst.msk [vmem:[#allocation2 + $0x8] sm:$0xff] %vm889_vm15, %v2002_v53  ;;  %v2000_v56 = vpop.permute.xlu0 %1999 }
 0xcd2   :  { %2005 = vst.msk [vmem:[#allocation2] sm:$0xff] %vm889_vm15, %v2000_v56 }
 0xcd8   :  { %v2008_v39 = vld [vmem:[#allocation2 + $0x8] sm:$0xff] }
 0xcd9   :  { %v2018_v58 = vadd.f32 %v2439_v57, %v2008_v39  ;;  %v2007_v60 = vld [vmem:[#allocation2] sm:$0xff] }
 0xcda   :  { %v2017_v40 = vadd.f32 %v2439_v57, %v2007_v60 }
 0xcdb   :  { %v2020_v41 = vadd.f32 %v2018_v58, %v3416_v25 }
 0xcdc   :  { %v2019_v61 = vadd.f32 %v2017_v40, %v3413_v24  ;;  %v2442_v24 = vld [vmem:[%s3619_s8 + $0x20] sm:$0xff] }
 0xcdd   :  { %v2024_v63 = vsel %vm61_vm0, %v2020_v41, 0.0  ;;  %v2868_v12 = vpack.c.bf16 %v2443_v10, %v2442_v24  ;;  %v2292_v24 = vld [vmem:[%s3625_s12 + $0x18] sm:$0xff] }
 0xcde   :  { %2025 = vadd.xlane.f32.xlu1 %v2024_v63  ;;  %v2021_v0 = vsel %vm61_vm0, %v2019_v61, 0.0 }
 0xcdf   :  { %2022 = vadd.xlane.f32.xlu0 %v2021_v0  ;;  %2869 = vmatprep.subr.bf16.mxu0 %v2868_v12 }
 0xce0   :  { %2871 = vmatpush3.bf16.msra.mxu0 %v2868_v12 }
 0xce1   :  { %2873 = vmatprep.subr.bf16.mxu0 %v2872_v15 }
 0xce4   :  { %2875 = vmatpush3.bf16.msra.mxu0 %v2872_v15 }
 0xd6b   :  { %v2026_v1 = vpop.xlane.xlu1 %2025 }
 0xd6c   :  { %v2028_v59 = vmul.f32 0.03125, %v2026_v1  ;;  %v2023_v4 = vpop.xlane.xlu0 %2022 }
 0xd6d   :  { %v2027_v5 = vmul.f32 0.03125, %v2023_v4 }
 0xd6e   :  { %v2030_v54 = vsub.f32 %v2020_v41, %v2028_v59 }
 0xd6f   :  { %v2029_v6 = vsub.f32 %v2019_v61, %v2027_v5 }
 0xd70   :  { %v2032_v52 = vmul.f32 %v2030_v54, %v2030_v54 }
 0xd71   :  { %v2031_v62 = vmul.f32 %v2029_v6, %v2029_v6 }
 0xd72   :  { %v2036_v25 = vsel %vm61_vm0, %v2032_v52, 0.0  ;;  %v2291_v52 = vld [vmem:[%s3625_s12 + $0x10] sm:$0xff] }
 0xd73   :  { %v2033_v36 = vsel %vm61_vm0, %v2031_v62, 0.0  ;;  %v2289_v62 = vld [vmem:[%s3625_s12] sm:$0xff]  ;;  %v2896_v10 = vpack.c.bf16 %v2292_v24, %v2291_v52 }
 0xd74   :  { %2034 = vadd.xlane.f32.xlu0 %v2033_v36  ;;  %v2290_v36 = vld [vmem:[%s3625_s12 + $0x8] sm:$0xff] }
 0xd78   :  { %2037 = vadd.xlane.f32.xlu0 %v2036_v25  ;;  %v2892_v25 = vpack.c.bf16 %v2290_v36, %v2289_v62 }
 0xd7a   :  { %2893 = vmatprep.subr.bf16.mxu0 %v2892_v25 }
 0xe01   :  { %v2035_v26 = vpop.xlane.xlu0 %2034 }
 0xe02   :  { %v2039_v9 = vmul.f32 0.03125, %v2035_v26 }
 0xe04   :  { %v2041_v13 = vadd.f32 1e-05, %v2039_v9  ;;  %v2462_v9 = vld [vmem:[%s3626_s13] ss:$0 sm:$0xff] }
 0xe05   :  { %v2038_v29 = vpop.xlane.xlu0 %2037 }
 0xe06   :  { %3030 = vrsqrt.f32 %v2041_v13  ;;  %v2040_v30 = vmul.f32 0.03125, %v2038_v29 }
 0xe08   :  { %v2042_v32 = vadd.f32 1e-05, %v2040_v30 }
 0xe0a   :  { %3032 = vrsqrt.f32 %v2042_v32 }
 0xe10   :  { %v3031_v34 = vpop.eup %3030 }
 0xe11   :  { %v2045_v37 = vmul.f32 %v3031_v34, %v2029_v6 }
 0xe13   :  { %v2053_v8 = vmul.f32 %v3553_v35, %v2045_v37 }
 0xe14   :  { %v3033_v42 = vpop.eup %3032 }
 0xe15   :  { %v2046_v43 = vmul.f32 %v3033_v42, %v2030_v54  ;;  %v2061_v44 = vadd.f32 %v3558_v38, %v2053_v8 }
 0xe17   :  { %2731 = vmatprep.mubr.msk.f32.mxu0 %vm61_vm0, %v2061_v44  ;;  %v2054_v55 = vmul.f32 %v3553_v35, %v2046_v43 }
 0xe19   :  { %v2062_v45 = vadd.f32 %v3558_v38, %v2054_v55 }
 0xe1b   :  { %2732 = vmatmul.mubr.msk.f32.vlgmr.msra.gmra.mrb[16].mxu0 %vm61_vm0, %v2062_v45 }
 0xe1c   :  { %2895 = vmatpush3.bf16.msra.mxu0 %v2892_v25 }
 0xe1d   :  { %2897 = vmatprep.subr.bf16.mxu0 %v2896_v10 }
 0xe20   :  { %2899 = vmatpush3.bf16.msra.mxu0 %v2896_v10 }
 0xeee   :  { %v2733_v31 = vpop.f32.mrb[16].mxu0 }
 0xeef   :  { %v2154_v7 = vadd.f32 %v2733_v31, %v2447_v28  ;;  %v2148_v46 = vpop.f32.mrb[17].mxu0 }
 0xef0   :  { %v2149_v47 = vadd.f32 %v2447_v28, %v2148_v46 }
 0xef1   :  { %v2158_v49 = vmax.f32 %v2154_v7, 0.0 }
 0xef2   :  { %v2157_v48 = vmax.f32 %v2149_v47, 0.0 }
 0xef4   :  { %2750 = vmatprep.mubr.msk.f32.mxu1 %vm1057_vm1, %v2157_v48 }
 0xef5   :  { %2751 = vmatmul.mubr.msk.f32.vlgmr.msra.gmra.mrb[16].mxu1 %vm1057_vm1, %v2158_v49 }
 0xfc8   :  { %v2752_v51 = vpop.f32.mrb[16].mxu1 }
 0xfc9   :  { %v2254_v53 = vadd.f32 %v2752_v51, %v2459_v50  ;;  %v2248_v56 = vpop.f32.mrb[17].mxu1 }
 0xfca   :  { %v2249_v57 = vadd.f32 %v2459_v50, %v2248_v56 }
 0xfcb   :  { %v2258_v39 = vadd.f32 %v2254_v53, %v2062_v45 }
 0xfcc   :  { %v2257_v58 = vadd.f32 %v2249_v57, %v2061_v44 }
 0xfcd   :  { %v2262_v60 = vsel %vm61_vm0, %v2258_v39, 0.0 }
 0xfce   :  { %2263 = vadd.xlane.f32.xlu0 %v2262_v60  ;;  %v2259_v40 = vsel %vm61_vm0, %v2257_v58, 0.0 }
 0xfcf   :  { %2260 = vadd.xlane.f32.xlu1 %v2259_v40 }
0x105b   :  { %v2264_v41 = vpop.xlane.xlu0 %2263 }
0x105c   :  { %v2266_v61 = vmul.f32 0.03125, %v2264_v41  ;;  %v2261_v63 = vpop.xlane.xlu1 %2260 }
0x105d   :  { %v2265_v0 = vmul.f32 0.03125, %v2261_v63 }
0x105e   :  { %v2268_v1 = vsub.f32 %v2258_v39, %v2266_v61 }
0x105f   :  { %v2267_v59 = vsub.f32 %v2257_v58, %v2265_v0 }
0x1060   :  { %v2270_v4 = vmul.f32 %v2268_v1, %v2268_v1 }
0x1061   :  { %v2269_v5 = vmul.f32 %v2267_v59, %v2267_v59 }
0x1062   :  { %v2274_v54 = vsel %vm61_vm0, %v2270_v4, 0.0 }
0x1063   :  { %2275 = vadd.xlane.f32.xlu0 %v2274_v54  ;;  %v2271_v6 = vsel %vm61_vm0, %v2269_v5, 0.0 }
0x1064   :  { %2272 = vadd.xlane.f32.xlu1 %v2271_v6 }
0x10f0   :  { %v2276_v11 = vpop.xlane.xlu0 %2275 }
0x10f1   :  { %v2278_v12 = vmul.f32 0.03125, %v2276_v11  ;;  %v2273_v2 = vpop.xlane.xlu1 %2272 }
0x10f2   :  { %v2277_v15 = vmul.f32 0.03125, %v2273_v2 }
0x10f3   :  { %v2280_v16 = vadd.f32 1e-05, %v2278_v12 }
0x10f4   :  { %v2279_v33 = vadd.f32 1e-05, %v2277_v15 }
0x10f5   :  { %3034 = vrsqrt.f32 %v2280_v16 }
0x10f6   :  { %3036 = vrsqrt.f32 %v2279_v33 }
0x10ff   :  { %v3035_v17 = vpop.eup %3034 }
0x1100   :  { %v3037_v14 = vpop.eup %3036  ;;  %v2284_v19 = vmul.f32 %v3035_v17, %v2268_v1 }
0x1101   :  { %v2283_v20 = vmul.f32 %v3037_v14, %v2267_v59 }
0x1102   :  { %v2286_v22 = vmul.f32 %v3553_v35, %v2284_v19 }
0x1103   :  { %v2285_v21 = vmul.f32 %v3553_v35, %v2283_v20 }
0x1104   :  { %v2288_v26 = vadd.f32 %v3558_v38, %v2286_v22 }
0x1105   :  { %v2287_v23 = vadd.f32 %v3558_v38, %v2285_v21 }
0x1107   :  { %2761 = vmatprep.mubr.msk.f32.mxu0 %vm61_vm0, %v2287_v23 }
0x1108   :  { %2762 = vmatmul.mubr.msk.f32.vlgmr.msra.gmra.mrb[18].mxu0 %vm61_vm0, %v2288_v26 }
0x11db   :  { %v2763_v13 = vpop.f32.mrb[18].mxu0 }
0x11dc   :  { %v2378_v29 = vadd.f32 %v2763_v13, %v2462_v9  ;;  %v2372_v30 = vpop.f32.mrb[19].mxu0 }
0x11dd   :  { %v2373_v32 = vadd.f32 %v2462_v9, %v2372_v30 }
0x11de   :  { %2382 = vst.msk [vmem:[%s3627_s14 + $0x8] sm:$0xff] %vm461_vm12, %v2378_v29 }
0x11df   :  { %2381 = vst.msk [vmem:[%s3627_s14] sm:$0xff] %vm461_vm12, %v2373_v32 }

</bundles_post_ra>
